<compile_context>
chip_gen: v7x
topology: tpu7x:2x2x1
jax: 0.10.0
libtpu: 0.0.40
codegen_flags: <defaults>
</compile_context>

<pallas_src>
import numpy as np

import jax
import jax.numpy as jnp
from jax import lax
from jax.experimental import pallas as pl
from jax.experimental.pallas import tpu as pltpu

BN_EPS = 1e-5  # PyTorch BatchNorm2d default


# ----------------------------------------------------------------------------
# Host-side helpers
# ----------------------------------------------------------------------------
def _round_up(x, m):
    return (x + m - 1) // m * m


def _interp_matrix_np(n_out, n_in):
    """(n_out, n_in) matrix for align_corners=True bilinear resize (numpy)."""
    src = np.arange(n_out, dtype=np.float64) * (n_in - 1) / max(n_out - 1, 1)
    i0 = np.floor(src).astype(np.int64)
    i1 = np.minimum(i0 + 1, n_in - 1)
    f = src - i0
    m = np.zeros((n_out, n_in), np.float32)
    m[np.arange(n_out), i0] += (1.0 - f).astype(np.float32)
    m[np.arange(n_out), i1] += f.astype(np.float32)
    return m


def _interp_taps_np(n_out, n_in):
    """Per-output-row 2-tap blend constants for align_corners bilinear."""
    src = np.arange(n_out, dtype=np.float64) * (n_in - 1) / max(n_out - 1, 1)
    i0 = np.floor(src).astype(np.int64)
    i1 = np.minimum(i0 + 1, n_in - 1)
    f = src - i0
    return ([int(v) for v in i0], [int(v) for v in i1],
            [float(v) for v in (1.0 - f)], [float(v) for v in f])


def make_conv_bn_params(key, cin, cout):
    """Conv(3x3, bias) + BatchNorm2d(eval) folded to (w_hwio, scale, shift)."""
    kw, kb, kg, kbeta, km, kv = jax.random.split(key, 6)
    fan_in = 3 * 3 * cin
    w = jax.random.normal(kw, (3, 3, cin, cout), jnp.float32) * (2.0 / fan_in) ** 0.5
    b = 0.01 * jax.random.normal(kb, (cout,), jnp.float32)
    gamma = 1.0 + 0.1 * jax.random.normal(kg, (cout,), jnp.float32)
    beta = 0.1 * jax.random.normal(kbeta, (cout,), jnp.float32)
    running_mean = 0.1 * jax.random.normal(km, (cout,), jnp.float32)
    running_var = 1.0 + 0.1 * jnp.abs(jax.random.normal(kv, (cout,), jnp.float32))
    scale = gamma / jnp.sqrt(running_var + BN_EPS)
    shift = beta + (b - running_mean) * scale
    return w, scale, shift


# ----------------------------------------------------------------------------
# Fused forward: upsample -> conv/BN/ReLU -> (split-weight concat) -> conv x2
# ----------------------------------------------------------------------------
def unet_up_origin_forward(inputs0, skips, params, *, mxu_dtype=jnp.float32):
    """inputs0: (N, H, W, in_size) NHWC; skips: tuple of (N, 2H, 2W, C_skip_i).
    Returns (N, 2H, 2W, out_size) NHWC."""
    (w_up, s_up, b_up), (w_c1, s_c1, b_c1), (w_c2, s_c2, b_c2) = params
    N, H, W, Cin = inputs0.shape
    Ho, Wo = 2 * H, 2 * W
    C1 = w_up.shape[-1]
    skip = skips[0] if len(skips) == 1 else jnp.concatenate(list(skips), axis=-1)
    Cskip = skip.shape[-1]

    # Flat zero-padded lane layout (see module docstring).
    WPAD = _round_up(Wo + 1, 8)                      # row pitch (>= Wo+1 for dx taps)
    NQ = Ho * WPAD                                   # lanes computed per image
    Q0 = _round_up(WPAD + 1, 128)                    # lane of pixel (0,0); 128-aligned
    ROWS = _round_up(Q0 + NQ + WPAD + 1, 128)        # total lanes incl. halos

    # --- host-side constants -------------------------------------------------
    a_wp = np.zeros((W, WPAD), np.float32)           # W-interp, zero gap columns
    a_wp[:, :Wo] = _interp_matrix_np(Wo, W).T
    i0_h, i1_h, w0_h, w1_h = _interp_taps_np(Ho, H)  # H-interp 2-tap blend consts

    mask_np = ((np.arange(NQ) % WPAD) < Wo).astype(np.float32).reshape(1, NQ)

    # im2col weights, (Cout, 9*Cin) with column order (ky, kx, cin).
    w_upT = w_up.reshape(9 * Cin, C1).T
    w_c1aT = w_c1[:, :, :C1, :].reshape(9 * C1, C1).T        # up-out half
    w_c1bT = w_c1[:, :, C1:, :].reshape(9 * Cskip, C1).T     # skip half
    w_c2T = w_c2.reshape(9 * C1, C1).T

    # Inputs in channel-on-sublane layouts.
    x0_r = jnp.transpose(inputs0, (0, 1, 3, 2)).reshape(N, H * Cin, W)  # h-major rows
    # TODO(synk): at realistic sizes DMA the unpadded skip tile and write the
    # halo inside the kernel instead of this extra XLA pad pass over HBM.
    skip_flat = jnp.pad(
        jnp.pad(jnp.transpose(skip, (0, 3, 1, 2)),
                ((0, 0), (0, 0), (0, 0), (0, WPAD - Wo))).reshape(N, Cskip, NQ),
        ((0, 0), (0, 0), (Q0, ROWS - Q0 - NQ)))                          # (N,Cskip,ROWS)

    def kernel(x0_ref, skip_ref, awp_ref, m_ref,
               wu_ref, su_ref, bu_ref,
               w1a_ref, w1b_ref, s1_ref, b1_ref,
               w2_ref, s2_ref, b2_ref, o_ref):
        f32 = jnp.float32

        def pad_lanes(core):
            # (C, NQ) -> (C, ROWS) with zero halos; 128-aligned seams, no scratch.
            c = core.shape[0]
            return jnp.concatenate(
                [jnp.zeros((c, Q0), f32), core,
                 jnp.zeros((c, ROWS - Q0 - NQ), f32)], axis=1)

        def im2col(buf):
            # 9 lane-shifted views of the flat padded slab, stacked on sublanes.
            return jnp.concatenate(
                [buf[:, Q0 + dy * WPAD + dx: Q0 + dy * WPAD + dx + NQ]
                 for dy in (-1, 0, 1) for dx in (-1, 0, 1)], axis=0)   # (9*C, NQ)

        def mm(a, b):
            return jnp.dot(a.astype(mxu_dtype), b.astype(mxu_dtype),
                           preferred_element_type=f32)

        msk = m_ref[...]                                # (1, NQ): 1.0 on real pixels

        # 1) separable bilinear x2 (align_corners) upsample:
        #    one skinny W-interp matmul, then a 2-tap H blend per output row.
        xw = mm(x0_ref[0], awp_ref[...])                # (H*Cin, WPAD), h-major rows
        rows = [w0_h[ho] * xw[i0_h[ho] * Cin:(i0_h[ho] + 1) * Cin, :]
                + w1_h[ho] * xw[i1_h[ho] * Cin:(i1_h[ho] + 1) * Cin, :]
                for ho in range(Ho)]                    # Ho x (Cin, WPAD)
        up = pad_lanes(jnp.concatenate(rows, axis=1))   # (Cin, ROWS)

        # 2) up-branch 3x3 conv + folded bias/BN + ReLU (one NT matmul).
        y = mm(wu_ref[...], im2col(up))                 # (C1, NQ) lane-dense
        y = jnp.maximum(y * su_ref[...] + bu_ref[...], 0.0) * msk
        act = pad_lanes(y)

        # 3) conv1 on cat([up_out, skip], C): channel concat never materialized,
        #    TWO accumulating matmuls on the split weight.
        y = (mm(w1a_ref[...], im2col(act))
             + mm(w1b_ref[...], im2col(skip_ref[0])))   # (C1, NQ)
        y = jnp.maximum(y * s1_ref[...] + b1_ref[...], 0.0) * msk
        act = pad_lanes(y)

        # 4) conv2 + BN + ReLU; transposed lane-dense store (C1 < 128 here).
        y = mm(w2_ref[...], im2col(act))                # (C1, NQ)
        y = jnp.maximum(y * s2_ref[...] + b2_ref[...], 0.0)
        o_ref[0] = y.astype(o_ref.dtype)

    out_t = pl.pallas_call(
        kernel,
        out_shape=jax.ShapeDtypeStruct((N, C1, NQ), inputs0.dtype),
        grid=(N,),
        in_specs=[
            pl.BlockSpec((1, H * Cin, W), lambda n: (n, 0, 0)),
            pl.BlockSpec((1, Cskip, ROWS), lambda n: (n, 0, 0)),
            pl.BlockSpec((W, WPAD), lambda n: (0, 0)),
            pl.BlockSpec((1, NQ), lambda n: (0, 0)),
            pl.BlockSpec((C1, 9 * Cin), lambda n: (0, 0)),
            pl.BlockSpec((C1, 1), lambda n: (0, 0)),
            pl.BlockSpec((C1, 1), lambda n: (0, 0)),
            pl.BlockSpec((C1, 9 * C1), lambda n: (0, 0)),
            pl.BlockSpec((C1, 9 * Cskip), lambda n: (0, 0)),
            pl.BlockSpec((C1, 1), lambda n: (0, 0)),
            pl.BlockSpec((C1, 1), lambda n: (0, 0)),
            pl.BlockSpec((C1, 9 * C1), lambda n: (0, 0)),
            pl.BlockSpec((C1, 1), lambda n: (0, 0)),
            pl.BlockSpec((C1, 1), lambda n: (0, 0)),
        ],
        out_specs=pl.BlockSpec((1, C1, NQ), lambda n: (n, 0, 0)),
        compiler_params=pltpu.CompilerParams(dimension_semantics=("parallel",)),
    )(x0_r, skip_flat, jnp.asarray(a_wp), jnp.asarray(mask_np),
      w_upT, s_up.reshape(C1, 1), b_up.reshape(C1, 1),
      w_c1aT, w_c1bT, s_c1.reshape(C1, 1), b_c1.reshape(C1, 1),
      w_c2T, s_c2.reshape(C1, 1), b_c2.reshape(C1, 1))

    # XLA-level un-flatten of the lane-dense (N, C1, Ho*WPAD) slab -> NHWC.
    return jnp.transpose(out_t.reshape(N, C1, Ho, WPAD)[:, :, :, :Wo], (0, 2, 3, 1))


# ----------------------------------------------------------------------------
# Pure-JAX reference (lax conv) for the correctness check
# ----------------------------------------------------------------------------
def _conv3x3_bn_relu_ref(x, w, scale, shift):
    y = lax.conv_general_dilated(x, w, (1, 1), 'SAME',
                                 dimension_numbers=('NHWC', 'HWIO', 'NHWC'))
    return jnp.maximum(y * scale + shift, 0.0)


def _upsample_ref(x):
    _, H, W, _ = x.shape
    a_h = jnp.asarray(_interp_matrix_np(2 * H, H))
    a_w = jnp.asarray(_interp_matrix_np(2 * W, W))
    return jnp.einsum('oh,pw,nhwc->nopc', a_h, a_w, x)


def _forward_ref(inputs0, skips, params):
    p_up, p_c1, p_c2 = params
    x = _conv3x3_bn_relu_ref(_upsample_ref(inputs0), *p_up)
    for s in skips:
        x = jnp.concatenate([x, s], axis=-1)
    x = _conv3x3_bn_relu_ref(x, *p_c1)
    x = _conv3x3_bn_relu_ref(x, *p_c2)
    return x


if __name__ == "__main__":
    N = 2
    in_size, out_size, n_concat = 8, 4, 2
    H = W = 8                     # inputs0 spatial; upsampled to 16x16

    key = jax.random.PRNGKey(0)
    k_in, k_skip, k_up, k_c1, k_c2 = jax.random.split(key, 5)

    inputs0 = jax.random.normal(k_in, (N, H, W, in_size), jnp.float32)
    # Skip feature map at 2x resolution; channels chosen so the concatenation
    # has in_size + (n_concat-2)*out_size channels, as unetConv2 expects.
    skip_ch = in_size - out_size
    skip = jax.random.normal(k_skip, (N, 2 * H, 2 * W, skip_ch), jnp.float32)

    params = (
        make_conv_bn_params(k_up, in_size, out_size),                              # self.up conv
        make_conv_bn_params(k_c1, in_size + (n_concat - 2) * out_size, out_size),  # unetConv2 conv1
        make_conv_bn_params(k_c2, out_size, out_size),                             # unetConv2 conv2
    )

    fwd = jax.jit(unet_up_origin_forward)
    out = jax.block_until_ready(fwd(inputs0, (skip,), params))
    ref = jax.block_until_ready(_forward_ref(inputs0, (skip,), params))

    assert out.shape == (N, 2 * H, 2 * W, out_size), out.shape
    max_err = float(jnp.max(jnp.abs(out - ref)))
    assert jnp.allclose(out, ref, atol=1e-4, rtol=1e-4), f"max_err={max_err}"
    print("KERNEL_OK")
</pallas_src>

<mosaic_0001>
module attributes {stable_mosaic.version = 11 : i64} {
  func.func @kernel(%arg0: i32, %arg1: memref<1x64x8xf32, #tpu.memory_space<vmem>>, %arg2: memref<1x4x640xf32, #tpu.memory_space<vmem>>, %arg3: memref<8x24xf32, #tpu.memory_space<vmem>>, %arg4: memref<1x384xf32, #tpu.memory_space<vmem>>, %arg5: memref<4x72xf32, #tpu.memory_space<vmem>>, %arg6: memref<4x1xf32, #tpu.memory_space<vmem>>, %arg7: memref<4x1xf32, #tpu.memory_space<vmem>>, %arg8: memref<4x36xf32, #tpu.memory_space<vmem>>, %arg9: memref<4x36xf32, #tpu.memory_space<vmem>>, %arg10: memref<4x1xf32, #tpu.memory_space<vmem>>, %arg11: memref<4x1xf32, #tpu.memory_space<vmem>>, %arg12: memref<4x36xf32, #tpu.memory_space<vmem>>, %arg13: memref<4x1xf32, #tpu.memory_space<vmem>>, %arg14: memref<4x1xf32, #tpu.memory_space<vmem>>, %arg15: memref<1x4x384xf32, #tpu.memory_space<vmem>>) attributes {dimension_semantics = [#tpu.dimension_semantics<parallel>], iteration_bounds = array<i64: 2>, scalar_prefetch = 0 : i64, scratch_operands = 0 : i64, tpu.core_type = #tpu.core_type<tc>, window_params = [{transform_indices = @transform_0, window_bounds = array<i64: 1, 64, 8>}, {transform_indices = @transform_1, window_bounds = array<i64: 1, 4, 640>}, {pipeline_mode = #tpu.pipeline_mode<synchronous>, transform_indices = @transform_2, window_bounds = array<i64: 8, 24>}, {pipeline_mode = #tpu.pipeline_mode<synchronous>, transform_indices = @transform_3, window_bounds = array<i64: 1, 384>}, {pipeline_mode = #tpu.pipeline_mode<synchronous>, transform_indices = @transform_4, window_bounds = array<i64: 4, 72>}, {pipeline_mode = #tpu.pipeline_mode<synchronous>, transform_indices = @transform_5, window_bounds = array<i64: 4, 1>}, {pipeline_mode = #tpu.pipeline_mode<synchronous>, transform_indices = @transform_6, window_bounds = array<i64: 4, 1>}, {pipeline_mode = #tpu.pipeline_mode<synchronous>, transform_indices = @transform_7, window_bounds = array<i64: 4, 36>}, {pipeline_mode = #tpu.pipeline_mode<synchronous>, transform_indices = @transform_8, window_bounds = array<i64: 4, 36>}, {pipeline_mode = #tpu.pipeline_mode<synchronous>, transform_indices = @transform_9, window_bounds = array<i64: 4, 1>}, {pipeline_mode = #tpu.pipeline_mode<synchronous>, transform_indices = @transform_10, window_bounds = array<i64: 4, 1>}, {pipeline_mode = #tpu.pipeline_mode<synchronous>, transform_indices = @transform_11, window_bounds = array<i64: 4, 36>}, {pipeline_mode = #tpu.pipeline_mode<synchronous>, transform_indices = @transform_12, window_bounds = array<i64: 4, 1>}, {pipeline_mode = #tpu.pipeline_mode<synchronous>, transform_indices = @transform_13, window_bounds = array<i64: 4, 1>}, {transform_indices = @transform_14, window_bounds = array<i64: 1, 4, 384>}]} {
    %c0 = arith.constant 0 : index
    %c0_0 = arith.constant 0 : index
    %0 = vector.load %arg4[%c0, %c0_0] : memref<1x384xf32, #tpu.memory_space<vmem>>, vector<1x384xf32>
    %c0_1 = arith.constant 0 : index
    %c0_2 = arith.constant 0 : index
    %c0_3 = arith.constant 0 : index
    %1 = vector.load %arg1[%c0_1, %c0_2, %c0_3] : memref<1x64x8xf32, #tpu.memory_space<vmem>>, vector<1x64x8xf32>
    %2 = vector.shape_cast %1 : vector<1x64x8xf32> to vector<64x8xf32>
    %c0_4 = arith.constant 0 : index
    %c0_5 = arith.constant 0 : index
    %3 = vector.load %arg3[%c0_4, %c0_5] : memref<8x24xf32, #tpu.memory_space<vmem>>, vector<8x24xf32>
    %cst = arith.constant dense<0.000000e+00> : vector<64x24xf32>
    %4 = tpu.matmul %2, %3, %cst {dimension_numbers = #tpu.dot_dimension_numbers<[1], [0], [0], [1], [0, 0, 1, 1], [], []>} : vector<64x8xf32>, vector<8x24xf32>, vector<64x24xf32> -> vector<64x24xf32>
    %5 = vector.extract_strided_slice %4 {offsets = [0, 0], sizes = [8, 24], strides = [1, 1]} : vector<64x24xf32> to vector<8x24xf32>
    %cst_6 = arith.constant 1.000000e+00 : f32
    %6 = vector.broadcast %cst_6 : f32 to vector<8x24xf32>
    %7 = arith.mulf %6, %5 : vector<8x24xf32>
    %8 = vector.extract_strided_slice %4 {offsets = [8, 0], sizes = [8, 24], strides = [1, 1]} : vector<64x24xf32> to vector<8x24xf32>
    %cst_7 = arith.constant 0.000000e+00 : f32
    %9 = vector.broadcast %cst_7 : f32 to vector<8x24xf32>
    %10 = arith.mulf %9, %8 : vector<8x24xf32>
    %11 = arith.addf %7, %10 : vector<8x24xf32>
    %12 = vector.extract_strided_slice %4 {offsets = [0, 0], sizes = [8, 24], strides = [1, 1]} : vector<64x24xf32> to vector<8x24xf32>
    %cst_8 = arith.constant 0.533333361 : f32
    %13 = vector.broadcast %cst_8 : f32 to vector<8x24xf32>
    %14 = arith.mulf %13, %12 : vector<8x24xf32>
    %15 = vector.extract_strided_slice %4 {offsets = [8, 0], sizes = [8, 24], strides = [1, 1]} : vector<64x24xf32> to vector<8x24xf32>
    %cst_9 = arith.constant 0.466666669 : f32
    %16 = vector.broadcast %cst_9 : f32 to vector<8x24xf32>
    %17 = arith.mulf %16, %15 : vector<8x24xf32>
    %18 = arith.addf %14, %17 : vector<8x24xf32>
    %19 = vector.extract_strided_slice %4 {offsets = [0, 0], sizes = [8, 24], strides = [1, 1]} : vector<64x24xf32> to vector<8x24xf32>
    %cst_10 = arith.constant 0.0666666701 : f32
    %20 = vector.broadcast %cst_10 : f32 to vector<8x24xf32>
    %21 = arith.mulf %20, %19 : vector<8x24xf32>
    %22 = vector.extract_strided_slice %4 {offsets = [8, 0], sizes = [8, 24], strides = [1, 1]} : vector<64x24xf32> to vector<8x24xf32>
    %cst_11 = arith.constant 0.933333337 : f32
    %23 = vector.broadcast %cst_11 : f32 to vector<8x24xf32>
    %24 = arith.mulf %23, %22 : vector<8x24xf32>
    %25 = arith.addf %21, %24 : vector<8x24xf32>
    %26 = vector.extract_strided_slice %4 {offsets = [8, 0], sizes = [8, 24], strides = [1, 1]} : vector<64x24xf32> to vector<8x24xf32>
    %cst_12 = arith.constant 6.000000e-01 : f32
    %27 = vector.broadcast %cst_12 : f32 to vector<8x24xf32>
    %28 = arith.mulf %27, %26 : vector<8x24xf32>
    %29 = vector.extract_strided_slice %4 {offsets = [16, 0], sizes = [8, 24], strides = [1, 1]} : vector<64x24xf32> to vector<8x24xf32>
    %cst_13 = arith.constant 4.000000e-01 : f32
    %30 = vector.broadcast %cst_13 : f32 to vector<8x24xf32>
    %31 = arith.mulf %30, %29 : vector<8x24xf32>
    %32 = arith.addf %28, %31 : vector<8x24xf32>
    %33 = vector.extract_strided_slice %4 {offsets = [8, 0], sizes = [8, 24], strides = [1, 1]} : vector<64x24xf32> to vector<8x24xf32>
    %cst_14 = arith.constant 0.13333334 : f32
    %34 = vector.broadcast %cst_14 : f32 to vector<8x24xf32>
    %35 = arith.mulf %34, %33 : vector<8x24xf32>
    %36 = vector.extract_strided_slice %4 {offsets = [16, 0], sizes = [8, 24], strides = [1, 1]} : vector<64x24xf32> to vector<8x24xf32>
    %cst_15 = arith.constant 0.866666674 : f32
    %37 = vector.broadcast %cst_15 : f32 to vector<8x24xf32>
    %38 = arith.mulf %37, %36 : vector<8x24xf32>
    %39 = arith.addf %35, %38 : vector<8x24xf32>
    %40 = vector.extract_strided_slice %4 {offsets = [16, 0], sizes = [8, 24], strides = [1, 1]} : vector<64x24xf32> to vector<8x24xf32>
    %cst_16 = arith.constant 0.666666686 : f32
    %41 = vector.broadcast %cst_16 : f32 to vector<8x24xf32>
    %42 = arith.mulf %41, %40 : vector<8x24xf32>
    %43 = vector.extract_strided_slice %4 {offsets = [24, 0], sizes = [8, 24], strides = [1, 1]} : vector<64x24xf32> to vector<8x24xf32>
    %cst_17 = arith.constant 0.333333343 : f32
    %44 = vector.broadcast %cst_17 : f32 to vector<8x24xf32>
    %45 = arith.mulf %44, %43 : vector<8x24xf32>
    %46 = arith.addf %42, %45 : vector<8x24xf32>
    %47 = vector.extract_strided_slice %4 {offsets = [16, 0], sizes = [8, 24], strides = [1, 1]} : vector<64x24xf32> to vector<8x24xf32>
    %cst_18 = arith.constant 2.000000e-01 : f32
    %48 = vector.broadcast %cst_18 : f32 to vector<8x24xf32>
    %49 = arith.mulf %48, %47 : vector<8x24xf32>
    %50 = vector.extract_strided_slice %4 {offsets = [24, 0], sizes = [8, 24], strides = [1, 1]} : vector<64x24xf32> to vector<8x24xf32>
    %cst_19 = arith.constant 8.000000e-01 : f32
    %51 = vector.broadcast %cst_19 : f32 to vector<8x24xf32>
    %52 = arith.mulf %51, %50 : vector<8x24xf32>
    %53 = arith.addf %49, %52 : vector<8x24xf32>
    %54 = vector.extract_strided_slice %4 {offsets = [24, 0], sizes = [8, 24], strides = [1, 1]} : vector<64x24xf32> to vector<8x24xf32>
    %cst_20 = arith.constant 0.733333349 : f32
    %55 = vector.broadcast %cst_20 : f32 to vector<8x24xf32>
    %56 = arith.mulf %55, %54 : vector<8x24xf32>
    %57 = vector.extract_strided_slice %4 {offsets = [32, 0], sizes = [8, 24], strides = [1, 1]} : vector<64x24xf32> to vector<8x24xf32>
    %cst_21 = arith.constant 0.266666681 : f32
    %58 = vector.broadcast %cst_21 : f32 to vector<8x24xf32>
    %59 = arith.mulf %58, %57 : vector<8x24xf32>
    %60 = arith.addf %56, %59 : vector<8x24xf32>
    %61 = vector.extract_strided_slice %4 {offsets = [24, 0], sizes = [8, 24], strides = [1, 1]} : vector<64x24xf32> to vector<8x24xf32>
    %cst_22 = arith.constant 0.266666681 : f32
    %62 = vector.broadcast %cst_22 : f32 to vector<8x24xf32>
    %63 = arith.mulf %62, %61 : vector<8x24xf32>
    %64 = vector.extract_strided_slice %4 {offsets = [32, 0], sizes = [8, 24], strides = [1, 1]} : vector<64x24xf32> to vector<8x24xf32>
    %cst_23 = arith.constant 0.733333349 : f32
    %65 = vector.broadcast %cst_23 : f32 to vector<8x24xf32>
    %66 = arith.mulf %65, %64 : vector<8x24xf32>
    %67 = arith.addf %63, %66 : vector<8x24xf32>
    %68 = vector.extract_strided_slice %4 {offsets = [32, 0], sizes = [8, 24], strides = [1, 1]} : vector<64x24xf32> to vector<8x24xf32>
    %cst_24 = arith.constant 8.000000e-01 : f32
    %69 = vector.broadcast %cst_24 : f32 to vector<8x24xf32>
    %70 = arith.mulf %69, %68 : vector<8x24xf32>
    %71 = vector.extract_strided_slice %4 {offsets = [40, 0], sizes = [8, 24], strides = [1, 1]} : vector<64x24xf32> to vector<8x24xf32>
    %cst_25 = arith.constant 2.000000e-01 : f32
    %72 = vector.broadcast %cst_25 : f32 to vector<8x24xf32>
    %73 = arith.mulf %72, %71 : vector<8x24xf32>
    %74 = arith.addf %70, %73 : vector<8x24xf32>
    %75 = vector.extract_strided_slice %4 {offsets = [32, 0], sizes = [8, 24], strides = [1, 1]} : vector<64x24xf32> to vector<8x24xf32>
    %cst_26 = arith.constant 0.333333343 : f32
    %76 = vector.broadcast %cst_26 : f32 to vector<8x24xf32>
    %77 = arith.mulf %76, %75 : vector<8x24xf32>
    %78 = vector.extract_strided_slice %4 {offsets = [40, 0], sizes = [8, 24], strides = [1, 1]} : vector<64x24xf32> to vector<8x24xf32>
    %cst_27 = arith.constant 0.666666686 : f32
    %79 = vector.broadcast %cst_27 : f32 to vector<8x24xf32>
    %80 = arith.mulf %79, %78 : vector<8x24xf32>
    %81 = arith.addf %77, %80 : vector<8x24xf32>
    %82 = vector.extract_strided_slice %4 {offsets = [40, 0], sizes = [8, 24], strides = [1, 1]} : vector<64x24xf32> to vector<8x24xf32>
    %cst_28 = arith.constant 0.866666674 : f32
    %83 = vector.broadcast %cst_28 : f32 to vector<8x24xf32>
    %84 = arith.mulf %83, %82 : vector<8x24xf32>
    %85 = vector.extract_strided_slice %4 {offsets = [48, 0], sizes = [8, 24], strides = [1, 1]} : vector<64x24xf32> to vector<8x24xf32>
    %cst_29 = arith.constant 0.13333334 : f32
    %86 = vector.broadcast %cst_29 : f32 to vector<8x24xf32>
    %87 = arith.mulf %86, %85 : vector<8x24xf32>
    %88 = arith.addf %84, %87 : vector<8x24xf32>
    %89 = vector.extract_strided_slice %4 {offsets = [40, 0], sizes = [8, 24], strides = [1, 1]} : vector<64x24xf32> to vector<8x24xf32>
    %cst_30 = arith.constant 4.000000e-01 : f32
    %90 = vector.broadcast %cst_30 : f32 to vector<8x24xf32>
    %91 = arith.mulf %90, %89 : vector<8x24xf32>
    %92 = vector.extract_strided_slice %4 {offsets = [48, 0], sizes = [8, 24], strides = [1, 1]} : vector<64x24xf32> to vector<8x24xf32>
    %cst_31 = arith.constant 6.000000e-01 : f32
    %93 = vector.broadcast %cst_31 : f32 to vector<8x24xf32>
    %94 = arith.mulf %93, %92 : vector<8x24xf32>
    %95 = arith.addf %91, %94 : vector<8x24xf32>
    %96 = vector.extract_strided_slice %4 {offsets = [48, 0], sizes = [8, 24], strides = [1, 1]} : vector<64x24xf32> to vector<8x24xf32>
    %cst_32 = arith.constant 0.933333337 : f32
    %97 = vector.broadcast %cst_32 : f32 to vector<8x24xf32>
    %98 = arith.mulf %97, %96 : vector<8x24xf32>
    %99 = vector.extract_strided_slice %4 {offsets = [56, 0], sizes = [8, 24], strides = [1, 1]} : vector<64x24xf32> to vector<8x24xf32>
    %cst_33 = arith.constant 0.0666666701 : f32
    %100 = vector.broadcast %cst_33 : f32 to vector<8x24xf32>
    %101 = arith.mulf %100, %99 : vector<8x24xf32>
    %102 = arith.addf %98, %101 : vector<8x24xf32>
    %103 = vector.extract_strided_slice %4 {offsets = [48, 0], sizes = [8, 24], strides = [1, 1]} : vector<64x24xf32> to vector<8x24xf32>
    %cst_34 = arith.constant 0.466666669 : f32
    %104 = vector.broadcast %cst_34 : f32 to vector<8x24xf32>
    %105 = arith.mulf %104, %103 : vector<8x24xf32>
    %106 = vector.extract_strided_slice %4 {offsets = [56, 0], sizes = [8, 24], strides = [1, 1]} : vector<64x24xf32> to vector<8x24xf32>
    %cst_35 = arith.constant 0.533333361 : f32
    %107 = vector.broadcast %cst_35 : f32 to vector<8x24xf32>
    %108 = arith.mulf %107, %106 : vector<8x24xf32>
    %109 = arith.addf %105, %108 : vector<8x24xf32>
    %110 = vector.extract_strided_slice %4 {offsets = [56, 0], sizes = [8, 24], strides = [1, 1]} : vector<64x24xf32> to vector<8x24xf32>
    %cst_36 = arith.constant 1.000000e+00 : f32
    %111 = vector.broadcast %cst_36 : f32 to vector<8x24xf32>
    %112 = arith.mulf %111, %110 : vector<8x24xf32>
    %113 = vector.extract_strided_slice %4 {offsets = [56, 0], sizes = [8, 24], strides = [1, 1]} : vector<64x24xf32> to vector<8x24xf32>
    %cst_37 = arith.constant 0.000000e+00 : f32
    %114 = vector.broadcast %cst_37 : f32 to vector<8x24xf32>
    %115 = arith.mulf %114, %113 : vector<8x24xf32>
    %116 = arith.addf %112, %115 : vector<8x24xf32>
    %117 = tpu.concatenate %11, %18, %25, %32, %39, %46, %53, %60, %67, %74, %81, %88, %95, %102, %109, %116 in 1 : vector<8x24xf32>, vector<8x24xf32>, vector<8x24xf32>, vector<8x24xf32>, vector<8x24xf32>, vector<8x24xf32>, vector<8x24xf32>, vector<8x24xf32>, vector<8x24xf32>, vector<8x24xf32>, vector<8x24xf32>, vector<8x24xf32>, vector<8x24xf32>, vector<8x24xf32>, vector<8x24xf32>, vector<8x24xf32> -> vector<8x384xf32>
    %cst_38 = arith.constant 0.000000e+00 : f32
    %118 = vector.broadcast %cst_38 : f32 to vector<8x128xf32>
    %cst_39 = arith.constant 0.000000e+00 : f32
    %119 = vector.broadcast %cst_39 : f32 to vector<8x128xf32>
    %120 = tpu.concatenate %118, %117, %119 in 1 : vector<8x128xf32>, vector<8x384xf32>, vector<8x128xf32> -> vector<8x640xf32>
    %c0_40 = arith.constant 0 : index
    %c0_41 = arith.constant 0 : index
    %121 = vector.load %arg5[%c0_40, %c0_41] : memref<4x72xf32, #tpu.memory_space<vmem>>, vector<4x72xf32>
    %122 = vector.extract_strided_slice %120 {offsets = [0, 103], sizes = [8, 384], strides = [1, 1]} : vector<8x640xf32> to vector<8x384xf32>
    %123 = vector.extract_strided_slice %120 {offsets = [0, 104], sizes = [8, 384], strides = [1, 1]} : vector<8x640xf32> to vector<8x384xf32>
    %124 = vector.extract_strided_slice %120 {offsets = [0, 105], sizes = [8, 384], strides = [1, 1]} : vector<8x640xf32> to vector<8x384xf32>
    %125 = vector.extract_strided_slice %120 {offsets = [0, 127], sizes = [8, 384], strides = [1, 1]} : vector<8x640xf32> to vector<8x384xf32>
    %126 = vector.extract_strided_slice %120 {offsets = [0, 128], sizes = [8, 384], strides = [1, 1]} : vector<8x640xf32> to vector<8x384xf32>
    %127 = vector.extract_strided_slice %120 {offsets = [0, 129], sizes = [8, 384], strides = [1, 1]} : vector<8x640xf32> to vector<8x384xf32>
    %128 = vector.extract_strided_slice %120 {offsets = [0, 151], sizes = [8, 384], strides = [1, 1]} : vector<8x640xf32> to vector<8x384xf32>
    %129 = vector.extract_strided_slice %120 {offsets = [0, 152], sizes = [8, 384], strides = [1, 1]} : vector<8x640xf32> to vector<8x384xf32>
    %130 = vector.extract_strided_slice %120 {offsets = [0, 153], sizes = [8, 384], strides = [1, 1]} : vector<8x640xf32> to vector<8x384xf32>
    %131 = tpu.concatenate %122, %123, %124, %125, %126, %127, %128, %129, %130 in 0 : vector<8x384xf32>, vector<8x384xf32>, vector<8x384xf32>, vector<8x384xf32>, vector<8x384xf32>, vector<8x384xf32>, vector<8x384xf32>, vector<8x384xf32>, vector<8x384xf32> -> vector<72x384xf32>
    %cst_42 = arith.constant dense<0.000000e+00> : vector<4x384xf32>
    %132 = tpu.matmul %121, %131, %cst_42 {dimension_numbers = #tpu.dot_dimension_numbers<[1], [0], [0], [1], [0, 0, 1, 1], [], []>} : vector<4x72xf32>, vector<72x384xf32>, vector<4x384xf32> -> vector<4x384xf32>
    %c0_43 = arith.constant 0 : index
    %c0_44 = arith.constant 0 : index
    %133 = vector.load %arg6[%c0_43, %c0_44] : memref<4x1xf32, #tpu.memory_space<vmem>>, vector<4x1xf32>
    %134 = vector.broadcast %133 : vector<4x1xf32> to vector<4x384xf32>
    %135 = arith.mulf %132, %134 : vector<4x384xf32>
    %c0_45 = arith.constant 0 : index
    %c0_46 = arith.constant 0 : index
    %136 = vector.load %arg7[%c0_45, %c0_46] : memref<4x1xf32, #tpu.memory_space<vmem>>, vector<4x1xf32>
    %137 = vector.broadcast %136 : vector<4x1xf32> to vector<4x384xf32>
    %138 = arith.addf %135, %137 : vector<4x384xf32>
    %cst_47 = arith.constant 0.000000e+00 : f32
    %139 = vector.broadcast %cst_47 : f32 to vector<4x384xf32>
    %140 = arith.maximumf %138, %139 : vector<4x384xf32>
    %141 = vector.broadcast %0 : vector<1x384xf32> to vector<4x384xf32>
    %142 = arith.mulf %140, %141 : vector<4x384xf32>
    %cst_48 = arith.constant 0.000000e+00 : f32
    %143 = vector.broadcast %cst_48 : f32 to vector<4x128xf32>
    %cst_49 = arith.constant 0.000000e+00 : f32
    %144 = vector.broadcast %cst_49 : f32 to vector<4x128xf32>
    %145 = tpu.concatenate %143, %142, %144 in 1 : vector<4x128xf32>, vector<4x384xf32>, vector<4x128xf32> -> vector<4x640xf32>
    %c0_50 = arith.constant 0 : index
    %c0_51 = arith.constant 0 : index
    %146 = vector.load %arg8[%c0_50, %c0_51] : memref<4x36xf32, #tpu.memory_space<vmem>>, vector<4x36xf32>
    %147 = vector.extract_strided_slice %145 {offsets = [0, 103], sizes = [4, 384], strides = [1, 1]} : vector<4x640xf32> to vector<4x384xf32>
    %148 = vector.extract_strided_slice %145 {offsets = [0, 104], sizes = [4, 384], strides = [1, 1]} : vector<4x640xf32> to vector<4x384xf32>
    %149 = vector.extract_strided_slice %145 {offsets = [0, 105], sizes = [4, 384], strides = [1, 1]} : vector<4x640xf32> to vector<4x384xf32>
    %150 = vector.extract_strided_slice %145 {offsets = [0, 127], sizes = [4, 384], strides = [1, 1]} : vector<4x640xf32> to vector<4x384xf32>
    %151 = vector.extract_strided_slice %145 {offsets = [0, 128], sizes = [4, 384], strides = [1, 1]} : vector<4x640xf32> to vector<4x384xf32>
    %152 = vector.extract_strided_slice %145 {offsets = [0, 129], sizes = [4, 384], strides = [1, 1]} : vector<4x640xf32> to vector<4x384xf32>
    %153 = vector.extract_strided_slice %145 {offsets = [0, 151], sizes = [4, 384], strides = [1, 1]} : vector<4x640xf32> to vector<4x384xf32>
    %154 = vector.extract_strided_slice %145 {offsets = [0, 152], sizes = [4, 384], strides = [1, 1]} : vector<4x640xf32> to vector<4x384xf32>
    %155 = vector.extract_strided_slice %145 {offsets = [0, 153], sizes = [4, 384], strides = [1, 1]} : vector<4x640xf32> to vector<4x384xf32>
    %156 = tpu.concatenate %147, %148, %149, %150, %151, %152, %153, %154, %155 in 0 : vector<4x384xf32>, vector<4x384xf32>, vector<4x384xf32>, vector<4x384xf32>, vector<4x384xf32>, vector<4x384xf32>, vector<4x384xf32>, vector<4x384xf32>, vector<4x384xf32> -> vector<36x384xf32>
    %cst_52 = arith.constant dense<0.000000e+00> : vector<4x384xf32>
    %157 = tpu.matmul %146, %156, %cst_52 {dimension_numbers = #tpu.dot_dimension_numbers<[1], [0], [0], [1], [0, 0, 1, 1], [], []>} : vector<4x36xf32>, vector<36x384xf32>, vector<4x384xf32> -> vector<4x384xf32>
    %c0_53 = arith.constant 0 : index
    %c0_54 = arith.constant 0 : index
    %158 = vector.load %arg9[%c0_53, %c0_54] : memref<4x36xf32, #tpu.memory_space<vmem>>, vector<4x36xf32>
    %c0_55 = arith.constant 0 : index
    %c0_56 = arith.constant 0 : index
    %c0_57 = arith.constant 0 : index
    %159 = vector.load %arg2[%c0_55, %c0_56, %c0_57] : memref<1x4x640xf32, #tpu.memory_space<vmem>>, vector<1x4x640xf32>
    %160 = vector.shape_cast %159 : vector<1x4x640xf32> to vector<4x640xf32>
    %161 = vector.extract_strided_slice %160 {offsets = [0, 103], sizes = [4, 384], strides = [1, 1]} : vector<4x640xf32> to vector<4x384xf32>
    %162 = vector.extract_strided_slice %160 {offsets = [0, 104], sizes = [4, 384], strides = [1, 1]} : vector<4x640xf32> to vector<4x384xf32>
    %163 = vector.extract_strided_slice %160 {offsets = [0, 105], sizes = [4, 384], strides = [1, 1]} : vector<4x640xf32> to vector<4x384xf32>
    %164 = vector.extract_strided_slice %160 {offsets = [0, 127], sizes = [4, 384], strides = [1, 1]} : vector<4x640xf32> to vector<4x384xf32>
    %165 = vector.extract_strided_slice %160 {offsets = [0, 128], sizes = [4, 384], strides = [1, 1]} : vector<4x640xf32> to vector<4x384xf32>
    %166 = vector.extract_strided_slice %160 {offsets = [0, 129], sizes = [4, 384], strides = [1, 1]} : vector<4x640xf32> to vector<4x384xf32>
    %167 = vector.extract_strided_slice %160 {offsets = [0, 151], sizes = [4, 384], strides = [1, 1]} : vector<4x640xf32> to vector<4x384xf32>
    %168 = vector.extract_strided_slice %160 {offsets = [0, 152], sizes = [4, 384], strides = [1, 1]} : vector<4x640xf32> to vector<4x384xf32>
    %169 = vector.extract_strided_slice %160 {offsets = [0, 153], sizes = [4, 384], strides = [1, 1]} : vector<4x640xf32> to vector<4x384xf32>
    %170 = tpu.concatenate %161, %162, %163, %164, %165, %166, %167, %168, %169 in 0 : vector<4x384xf32>, vector<4x384xf32>, vector<4x384xf32>, vector<4x384xf32>, vector<4x384xf32>, vector<4x384xf32>, vector<4x384xf32>, vector<4x384xf32>, vector<4x384xf32> -> vector<36x384xf32>
    %cst_58 = arith.constant dense<0.000000e+00> : vector<4x384xf32>
    %171 = tpu.matmul %158, %170, %cst_58 {dimension_numbers = #tpu.dot_dimension_numbers<[1], [0], [0], [1], [0, 0, 1, 1], [], []>} : vector<4x36xf32>, vector<36x384xf32>, vector<4x384xf32> -> vector<4x384xf32>
    %172 = arith.addf %157, %171 : vector<4x384xf32>
    %c0_59 = arith.constant 0 : index
    %c0_60 = arith.constant 0 : index
    %173 = vector.load %arg10[%c0_59, %c0_60] : memref<4x1xf32, #tpu.memory_space<vmem>>, vector<4x1xf32>
    %174 = vector.broadcast %173 : vector<4x1xf32> to vector<4x384xf32>
    %175 = arith.mulf %172, %174 : vector<4x384xf32>
    %c0_61 = arith.constant 0 : index
    %c0_62 = arith.constant 0 : index
    %176 = vector.load %arg11[%c0_61, %c0_62] : memref<4x1xf32, #tpu.memory_space<vmem>>, vector<4x1xf32>
    %177 = vector.broadcast %176 : vector<4x1xf32> to vector<4x384xf32>
    %178 = arith.addf %175, %177 : vector<4x384xf32>
    %cst_63 = arith.constant 0.000000e+00 : f32
    %179 = vector.broadcast %cst_63 : f32 to vector<4x384xf32>
    %180 = arith.maximumf %178, %179 : vector<4x384xf32>
    %181 = vector.broadcast %0 : vector<1x384xf32> to vector<4x384xf32>
    %182 = arith.mulf %180, %181 : vector<4x384xf32>
    %cst_64 = arith.constant 0.000000e+00 : f32
    %183 = vector.broadcast %cst_64 : f32 to vector<4x128xf32>
    %cst_65 = arith.constant 0.000000e+00 : f32
    %184 = vector.broadcast %cst_65 : f32 to vector<4x128xf32>
    %185 = tpu.concatenate %183, %182, %184 in 1 : vector<4x128xf32>, vector<4x384xf32>, vector<4x128xf32> -> vector<4x640xf32>
    %c0_66 = arith.constant 0 : index
    %c0_67 = arith.constant 0 : index
    %186 = vector.load %arg12[%c0_66, %c0_67] : memref<4x36xf32, #tpu.memory_space<vmem>>, vector<4x36xf32>
    %187 = vector.extract_strided_slice %185 {offsets = [0, 103], sizes = [4, 384], strides = [1, 1]} : vector<4x640xf32> to vector<4x384xf32>
    %188 = vector.extract_strided_slice %185 {offsets = [0, 104], sizes = [4, 384], strides = [1, 1]} : vector<4x640xf32> to vector<4x384xf32>
    %189 = vector.extract_strided_slice %185 {offsets = [0, 105], sizes = [4, 384], strides = [1, 1]} : vector<4x640xf32> to vector<4x384xf32>
    %190 = vector.extract_strided_slice %185 {offsets = [0, 127], sizes = [4, 384], strides = [1, 1]} : vector<4x640xf32> to vector<4x384xf32>
    %191 = vector.extract_strided_slice %185 {offsets = [0, 128], sizes = [4, 384], strides = [1, 1]} : vector<4x640xf32> to vector<4x384xf32>
    %192 = vector.extract_strided_slice %185 {offsets = [0, 129], sizes = [4, 384], strides = [1, 1]} : vector<4x640xf32> to vector<4x384xf32>
    %193 = vector.extract_strided_slice %185 {offsets = [0, 151], sizes = [4, 384], strides = [1, 1]} : vector<4x640xf32> to vector<4x384xf32>
    %194 = vector.extract_strided_slice %185 {offsets = [0, 152], sizes = [4, 384], strides = [1, 1]} : vector<4x640xf32> to vector<4x384xf32>
    %195 = vector.extract_strided_slice %185 {offsets = [0, 153], sizes = [4, 384], strides = [1, 1]} : vector<4x640xf32> to vector<4x384xf32>
    %196 = tpu.concatenate %187, %188, %189, %190, %191, %192, %193, %194, %195 in 0 : vector<4x384xf32>, vector<4x384xf32>, vector<4x384xf32>, vector<4x384xf32>, vector<4x384xf32>, vector<4x384xf32>, vector<4x384xf32>, vector<4x384xf32>, vector<4x384xf32> -> vector<36x384xf32>
    %cst_68 = arith.constant dense<0.000000e+00> : vector<4x384xf32>
    %197 = tpu.matmul %186, %196, %cst_68 {dimension_numbers = #tpu.dot_dimension_numbers<[1], [0], [0], [1], [0, 0, 1, 1], [], []>} : vector<4x36xf32>, vector<36x384xf32>, vector<4x384xf32> -> vector<4x384xf32>
    %c0_69 = arith.constant 0 : index
    %c0_70 = arith.constant 0 : index
    %198 = vector.load %arg13[%c0_69, %c0_70] : memref<4x1xf32, #tpu.memory_space<vmem>>, vector<4x1xf32>
    %199 = vector.broadcast %198 : vector<4x1xf32> to vector<4x384xf32>
    %200 = arith.mulf %197, %199 : vector<4x384xf32>
    %c0_71 = arith.constant 0 : index
    %c0_72 = arith.constant 0 : index
    %201 = vector.load %arg14[%c0_71, %c0_72] : memref<4x1xf32, #tpu.memory_space<vmem>>, vector<4x1xf32>
    %202 = vector.broadcast %201 : vector<4x1xf32> to vector<4x384xf32>
    %203 = arith.addf %200, %202 : vector<4x384xf32>
    %cst_73 = arith.constant 0.000000e+00 : f32
    %204 = vector.broadcast %cst_73 : f32 to vector<4x384xf32>
    %205 = arith.maximumf %203, %204 : vector<4x384xf32>
    %c0_74 = arith.constant 0 : index
    %c0_75 = arith.constant 0 : index
    %c0_76 = arith.constant 0 : index
    %206 = vector.load %arg15[%c0_74, %c0_75, %c0_76] : memref<1x4x384xf32, #tpu.memory_space<vmem>>, vector<1x4x384xf32>
    %207 = vector.shape_cast %206 : vector<1x4x384xf32> to vector<4x384xf32>
    %208 = vector.shape_cast %205 : vector<4x384xf32> to vector<1x4x384xf32>
    tpu.vector_store %arg15[%c0_74, %c0_75, %c0_76], %208 {strides = array<i32>} : memref<1x4x384xf32, #tpu.memory_space<vmem>>, vector<1x4x384xf32>,
    return
  }
  func.func @transform_0(%arg0: i32) -> (i32, i32, i32) {
    %c0_i32 = arith.constant 0 : i32
    %c0_i32_0 = arith.constant 0 : i32
    %c0_i32_1 = arith.constant 0 : i32
    return %arg0, %c0_i32, %c0_i32_0 : i32, i32, i32
  }
  func.func @transform_1(%arg0: i32) -> (i32, i32, i32) {
    %c0_i32 = arith.constant 0 : i32
    %c0_i32_0 = arith.constant 0 : i32
    %c0_i32_1 = arith.constant 0 : i32
    return %arg0, %c0_i32, %c0_i32_0 : i32, i32, i32
  }
  func.func @transform_2(%arg0: i32) -> (i32, i32) {
    %c0_i32 = arith.constant 0 : i32
    %c0_i32_0 = arith.constant 0 : i32
    %c0_i32_1 = arith.constant 0 : i32
    return %c0_i32, %c0_i32_0 : i32, i32
  }
  func.func @transform_3(%arg0: i32) -> (i32, i32) {
    %c0_i32 = arith.constant 0 : i32
    %c0_i32_0 = arith.constant 0 : i32
    %c0_i32_1 = arith.constant 0 : i32
    return %c0_i32, %c0_i32_0 : i32, i32
  }
  func.func @transform_4(%arg0: i32) -> (i32, i32) {
    %c0_i32 = arith.constant 0 : i32
    %c0_i32_0 = arith.constant 0 : i32
    %c0_i32_1 = arith.constant 0 : i32
    return %c0_i32, %c0_i32_0 : i32, i32
  }
  func.func @transform_5(%arg0: i32) -> (i32, i32) {
    %c0_i32 = arith.constant 0 : i32
    %c0_i32_0 = arith.constant 0 : i32
    %c0_i32_1 = arith.constant 0 : i32
    return %c0_i32, %c0_i32_0 : i32, i32
  }
  func.func @transform_6(%arg0: i32) -> (i32, i32) {
    %c0_i32 = arith.constant 0 : i32
    %c0_i32_0 = arith.constant 0 : i32
    %c0_i32_1 = arith.constant 0 : i32
    return %c0_i32, %c0_i32_0 : i32, i32
  }
  func.func @transform_7(%arg0: i32) -> (i32, i32) {
    %c0_i32 = arith.constant 0 : i32
    %c0_i32_0 = arith.constant 0 : i32
    %c0_i32_1 = arith.constant 0 : i32
    return %c0_i32, %c0_i32_0 : i32, i32
  }
  func.func @transform_8(%arg0: i32) -> (i32, i32) {
    %c0_i32 = arith.constant 0 : i32
    %c0_i32_0 = arith.constant 0 : i32
    %c0_i32_1 = arith.constant 0 : i32
    return %c0_i32, %c0_i32_0 : i32, i32
  }
  func.func @transform_9(%arg0: i32) -> (i32, i32) {
    %c0_i32 = arith.constant 0 : i32
    %c0_i32_0 = arith.constant 0 : i32
    %c0_i32_1 = arith.constant 0 : i32
    return %c0_i32, %c0_i32_0 : i32, i32
  }
  func.func @transform_10(%arg0: i32) -> (i32, i32) {
    %c0_i32 = arith.constant 0 : i32
    %c0_i32_0 = arith.constant 0 : i32
    %c0_i32_1 = arith.constant 0 : i32
    return %c0_i32, %c0_i32_0 : i32, i32
  }
  func.func @transform_11(%arg0: i32) -> (i32, i32) {
    %c0_i32 = arith.constant 0 : i32
    %c0_i32_0 = arith.constant 0 : i32
    %c0_i32_1 = arith.constant 0 : i32
    return %c0_i32, %c0_i32_0 : i32, i32
  }
  func.func @transform_12(%arg0: i32) -> (i32, i32) {
    %c0_i32 = arith.constant 0 : i32
    %c0_i32_0 = arith.constant 0 : i32
    %c0_i32_1 = arith.constant 0 : i32
    return %c0_i32, %c0_i32_0 : i32, i32
  }
  func.func @transform_13(%arg0: i32) -> (i32, i32) {
    %c0_i32 = arith.constant 0 : i32
    %c0_i32_0 = arith.constant 0 : i32
    %c0_i32_1 = arith.constant 0 : i32
    return %c0_i32, %c0_i32_0 : i32, i32
  }
  func.func @transform_14(%arg0: i32) -> (i32, i32, i32) {
    %c0_i32 = arith.constant 0 : i32
    %c0_i32_0 = arith.constant 0 : i32
    %c0_i32_1 = arith.constant 0 : i32
    return %arg0, %c0_i32, %c0_i32_0 : i32, i32, i32
  }
}

</mosaic_0001>

<bundles_post_ra>
// kernel: unet_up_origin_forward.1
= control target key start
LH: loop header
LB: loop body
LE: loop exit
PB: predicated region body
PF: predicated region fallthrough
CT: control target
= control target key end

     0   :  { %s3184_s29 = smov 0   ;;  %s3933_s0 = inlined_call_operand.vmem [shape: f32[2,64,8], index: 0, kind: input, shape index: {}]   ;;  %s3934_s1 = inlined_call_operand.vmem [shape: f32[2,4,640], index: 1, kind: input, shape index: {}]   ;;  %s3935_s2 = inlined_call_operand.vmem [shape: f32[8,24], index: 2, kind: input, shape index: {}]   ;;  %s3936_s3 = inlined_call_operand.vmem [shape: f32[1,384], index: 3, kind: input, shape index: {}]   ;;  %s3937_s4 = inlined_call_operand.vmem [shape: f32[4,72], index: 4, kind: input, shape index: {}]   ;;  %s3938_s5 = inlined_call_operand.vmem [shape: f32[4,1], index: 5, kind: input, shape index: {}]   ;;  %s3939_s6 = inlined_call_operand.vmem [shape: f32[4,1], index: 6, kind: input, shape index: {}]   ;;  %s3940_s7 = inlined_call_operand.vmem [shape: f32[4,36], index: 7, kind: input, shape index: {}]   ;;  %s3941_s8 = inlined_call_operand.vmem [shape: f32[4,36], index: 8, kind: input, shape index: {}]   ;;  %s3942_s9 = inlined_call_operand.vmem [shape: f32[4,1], index: 9, kind: input, shape index: {}]   ;;  %s3943_s10 = inlined_call_operand.vmem [shape: f32[4,1], index: 10, kind: input, shape index: {}]   ;;  %s3944_s11 = inlined_call_operand.vmem [shape: f32[4,36], index: 11, kind: input, shape index: {}]   ;;  %s3945_s12 = inlined_call_operand.vmem [shape: f32[4,1], index: 12, kind: input, shape index: {}]   ;;  %s3946_s13 = inlined_call_operand.vmem [shape: f32[4,1], index: 13, kind: input, shape index: {}]   ;;  %s3947_s14 = inlined_call_operand.vmem [shape: f32[2,4,384], index: 14, kind: output, shape index: {}]  }
   0x1 LB: > { %s2385_s30 = sadd.s32 4294967295, %s3081_s29   ;;  %p2389_p0 = scmp.ge.s32.totalorder %s3081_s29, 1  ;;  %s3081_s29 = sphi %s3184_s29, %s24_s29  }
   0x2   : > { %p422_p1 = scmp.lt.s32.totalorder %s3081_s29, 3 }
   0x4   : > { %p423_p2 = pnand %p2389_p0, %p422_p1 }
   0x5   : > { %v497_v0 = vld [vmem:[%s3935_s2] sm:$0xff] (!%p423_p2)  ;;  %p473_p3 = scmp.lt.s32.totalorder (!%p423_p2), %s2385_s30, 1  ;;  %vm498_vm0 = vcmask (!%p423_p2), 64512   ;;  %s3083_s21 = smov (!%p423_p2), 48   ;;  %v3093_v61 = vmov (!%p423_p2), 0.0   ;;  %vm734_vm1 = vcmask (!%p423_p2), 195584  }
   0x6   : > { %426 = sbr.rel (%p423_p2) target bundleno = 1891 (0x763), region = 76  ;;  %2459 = vmatprep.subr.mxu0 (!%p423_p2), %v497_v0  ;;  %s3084_s22 = smov (!%p423_p2), 24   ;;  %1053 = vmatprep.mubr.f32.mxu1 (!%p423_p2), %v3093_v61  ;;  %vm736_vm2 = vcmask (!%p423_p2), 392192   ;;  %vm738_vm3 = vcmask (!%p423_p2), 588800   ;;  %vm744_vm4 = vcmask (!%p423_p2), 130048   ;;  %vm740_vm5 = vcmask (!%p423_p2), 785408  }
   0x7   : > { %2460 = vmatpush3.msra.mxu0 (!%p423_p2), %v497_v0  ;;  %s3085_s23 = smov (!%p423_p2), 120   ;;  %s3086_s24 = smov (!%p423_p2), 16   ;;  %vm746_vm6 = vcmask (!%p423_p2), 326656   ;;  %vm748_vm7 = vcmask (!%p423_p2), 523264   ;;  %vm750_vm8 = vcmask (!%p423_p2), 719872   ;;  %vm742_vm9 = vcmask (!%p423_p2), 982016  }
   0x8   : > { %s3087_s25 = smov (!%p423_p2), 72   ;;  %s3088_s26 = smov (!%p423_p2), 96   ;;  %vm752_vm10 = vcmask (!%p423_p2), 916480   ;;  %vm755_vm11 = vcmask (!%p423_p2), 261120   ;;  %vm757_vm12 = vcmask (!%p423_p2), 457728   ;;  %vm759_vm13 = vcmask (!%p423_p2), 654336  }
   0x9   : > { %s3089_s27 = smov (!%p423_p2), 40   ;;  %s3090_s28 = smov (!%p423_p2), 112   ;;  %vm761_vm14 = vcmask (!%p423_p2), 850944   ;;  %vm776_vm15 = vcmask (!%p423_p2), 1039360  }
   0xa   : > { %s3091_s15 = smov (!%p423_p2), 88   ;;  %s3092_s16 = smov (!%p423_p2), 64  }
   0xb   : > { %s3095_s18 = smov (!%p423_p2), 32   ;;  %s3096_s19 = smov (!%p423_p2), 56  }
   0xd   : > { %s3949_s30 = smov (!%p473_p3, %s2385_s30), 1 }
   0xe   : > { %s2421_s17 = sshll.u32 %s3949_s30, 6 }
   0xf   : > { %s477_s20 = scalar_lea.vmem %s3933_s0, %s2421_s17  ;;  %s3094_s17 = smov 8  }
  0x10   : > { %v489_v1 = vld [vmem:[%s477_s20] sm:$0xff]  ;;  %v490_v2 = vld [vmem:[%s477_s20 + $0x8] sm:$0xff]  ;;  %v491_v3 = vld [vmem:[%s477_s20 + $0x10] sm:$0xff] }
  0x11   : > { %2461 = vmatprep.mubr.msk.f32.mxu0 %vm498_vm0, %v489_v1  ;;  %v492_v4 = vld [vmem:[%s477_s20 + $0x18] sm:$0xff]  ;;  %v493_v5 = vld [vmem:[%s477_s20 + $0x20] sm:$0xff]  ;;  %v494_v6 = vld [vmem:[%s477_s20 + $0x28] sm:$0xff] }
  0x12   : > { %2462 = vmatmul.mubr.msk.f32.vlgmr.msra.gmra.mrb[0].mxu0 %vm498_vm0, %v490_v2  ;;  %v495_v7 = vld [vmem:[%s477_s20 + $0x30] sm:$0xff]  ;;  %v496_v8 = vld [vmem:[%s477_s20 + $0x38] sm:$0xff]  ;;  %s3097_s20 = smov 80  }
  0x13   : > { %2464 = vmatprep.mubr.msk.f32.mxu0 %vm498_vm0, %v491_v3 }
  0x16   : > { %2465 = vmatmul.mubr.msk.f32.gmra.mrb[2].mxu0 %vm498_vm0, %v492_v4 }
  0x17   : > { %2467 = vmatprep.mubr.msk.f32.mxu0 %vm498_vm0, %v493_v5 }
  0x1a   : > { %2468 = vmatmul.mubr.msk.f32.gmra.mrb[4].mxu0 %vm498_vm0, %v494_v6 }
  0x1b   : > { %2470 = vmatprep.mubr.msk.f32.mxu0 %vm498_vm0, %v495_v7 }
  0x1e   : > { %2471 = vmatmul.mubr.msk.f32.gmra.mrb[6].mxu0 %vm498_vm0, %v496_v8 }
  0xe5   : > { %v2463_v9 = vpop.f32.mrb[0].mxu0 }
  0xe6   : > { %v589_v10 = vpop.f32.mrb[1].mxu0  ;;  %v628_v11 = vmul.f32 0.0, %v2463_v9  ;;  %v634_v12 = vmul.f32 0.93333334, %v2463_v9  ;;  %v631_v13 = vmul.f32 0.46666667, %v2463_v9 }
  0xe7   : > { %v633_v14 = vmul.f32 0.06666667, %v589_v10  ;;  %v630_v15 = vmul.f32 0.53333336, %v589_v10  ;;  %v639_v21 = vmul.f32 0.13333334, %v2463_v9 }
  0xe8   : > { %v3209_v16 = vadd.f32 %v628_v11, %v589_v10  ;;  %v636_v24 = vmul.f32 0.6, %v2463_v9 }
  0xe9   : > { %v2466_v17 = vpop.f32.mrb[2].mxu0  ;;  %v635_v18 = vadd.f32 %v634_v12, %v633_v14  ;;  %v632_v19 = vadd.f32 %v631_v13, %v630_v15 }
  0xea   : > { %v643_v20 = vmul.f32 0.33333334, %v2466_v17  ;;  %v646_v22 = vmul.f32 0.8, %v2466_v17  ;;  %v599_v23 = vpop.f32.mrb[3].mxu0 }
  0xeb   : > { %679 = vrot.lane.b32.xlu1 %v635_v18, %s3083_s21  ;;  %675 = vrot.lane.b32.xlu0 %v632_v19, %s3084_s22  ;;  %v637_v25 = vmul.f32 0.4, %v599_v23  ;;  %v640_v26 = vmul.f32 0.8666667, %v599_v23  ;;  %v642_v27 = vmul.f32 0.6666667, %v599_v23 }
  0xec   : > { %v648_v28 = vmul.f32 0.73333335, %v2466_v17  ;;  %v645_v29 = vmul.f32 0.2, %v599_v23  ;;  %v651_v31 = vmul.f32 0.26666668, %v2466_v17 }
  0xed   : > { %v2469_v30 = vpop.f32.mrb[4].mxu0  ;;  %v644_v34 = vadd.f32 %v643_v20, %v642_v27  ;;  %v641_v38 = vadd.f32 %v640_v26, %v639_v21  ;;  %v638_v39 = vadd.f32 %v637_v25, %v636_v24  ;;  %s3098_s21 = smov 104   ;;  %s3099_s22 = smov 127  }
  0xee   : > { %v655_v32 = vmul.f32 0.2, %v2469_v30  ;;  %v658_v33 = vmul.f32 0.6666667, %v2469_v30  ;;  %v660_v35 = vmul.f32 0.8666667, %v2469_v30  ;;  %v647_v37 = vadd.f32 %v646_v22, %v645_v29 }
  0xef   : > { %v609_v36 = vpop.f32.mrb[5].mxu0  ;;  %691 = vrot.lane.b32.xlu0 %v644_v34, %s3085_s23  ;;  %v663_v43 = vmul.f32 0.4, %v2469_v30  ;;  %s3100_s23 = smov 126  }
  0xf0   : > { %v649_v40 = vmul.f32 0.26666668, %v609_v36  ;;  %v652_v41 = vmul.f32 0.73333335, %v609_v36  ;;  %v654_v42 = vmul.f32 0.8, %v609_v36  ;;  %695 = vrot.lane.b32.xlu1 %v647_v37, %s3086_s24 }
  0xf1   : > { %v657_v44 = vmul.f32 0.33333334, %v609_v36  ;;  %v2472_v45 = vpop.f32.mrb[6].mxu0  ;;  %s3101_s24 = smov 103  }
  0xf2   : > { %v667_v46 = vmul.f32 0.06666667, %v2472_v45  ;;  %v670_v47 = vmul.f32 0.53333336, %v2472_v45  ;;  %v619_v48 = vpop.f32.mrb[7].mxu0  ;;  %v650_v49 = vadd.f32 %v649_v40, %v648_v28  ;;  %v653_v55 = vadd.f32 %v652_v41, %v651_v31 }
  0xf3   : > { %v661_v50 = vmul.f32 0.13333334, %v619_v48  ;;  %v664_v51 = vmul.f32 0.6, %v619_v48  ;;  %v666_v52 = vmul.f32 0.93333334, %v619_v48  ;;  %v659_v53 = vadd.f32 %v658_v33, %v657_v44  ;;  %683 = vrot.lane.b32.xlu0 %v638_v39, %s3087_s25 }
  0xf4   : > { %v669_v54 = vmul.f32 0.46666667, %v619_v48  ;;  %v656_v56 = vadd.f32 %v655_v32, %v654_v42  ;;  %687 = vrot.lane.b32.xlu1 %v641_v38, %s3088_s26  ;;  %v672_v62 = vmul.f32 0.0, %v2472_v45  ;;  %s3102_s25 = smov 102   ;;  %s3103_s26 = smov 79  }
  0xf5   : > { %v665_v57 = vadd.f32 %v664_v51, %v663_v43  ;;  %v662_v58 = vadd.f32 %v661_v50, %v660_v35  ;;  %v668_v59 = vadd.f32 %v667_v46, %v666_v52  ;;  %v3106_v51 = vmov 0.0|0.0  }
  0xf6   : > { %v671_v60 = vadd.f32 %v670_v47, %v669_v54  ;;  %v673_v63 = vadd.f32 %v2472_v45, %v672_v62  ;;  %2549 = vmatprep.subr.bf16.mxu0 %v3106_v51 }
  0xf7   : > { %699 = vrot.lane.b32.xlu0 %v650_v49, %s3089_s27  ;;  %s3104_s27 = smov 78  }
  0xf8   : > { %711 = vrot.lane.b32.xlu1 %v659_v53, %s3090_s28  ;;  %s3105_s28 = smov 25  }
  0xfb   : > { %707 = vrot.lane.b32.xlu0 %v656_v56, %s3091_s15  ;;  %s2607_s15 = smul.u32 20, %s3949_s30 }
  0xfc   : > { %703 = vrot.lane.b32.xlu1 %v653_v55, %s3092_s16 }
  0xff   : > { %715 = vrot.lane.b32.xlu0 %v662_v58, %s3094_s17 }
 0x100   : > { %719 = vrot.lane.b32.xlu1 %v665_v57, %s3095_s18  ;;  %s482_s18 = scalar_lea.vmem %s3934_s1, %s2607_s15 }
 0x103   : > { %723 = vrot.lane.b32.xlu0 %v668_v59, %s3096_s19 }
 0x104   : > { %727 = vrot.lane.b32.xlu1 %v671_v60, %s3097_s20 }
 0x107   : > { %731 = vrot.lane.b32.xlu0 %v673_v63, %s3098_s21 }
 0x15d   : > { %v680_v0 = vpop.permute.xlu1 %679  ;;  %v676_v1 = vpop.permute.xlu0 %675 }
 0x15e   : > { %v735_v6 = vsel %vm734_vm1, %v3209_v16, %v676_v1  ;;  %vm788_vm1 = vcmask 1031168  }
 0x15f   : > { %v737_v8 = vsel %vm736_vm2, %v735_v6, %v680_v0  ;;  %vm843_vm2 = vcmask 646144  }
 0x161   : > { %v692_v2 = vpop.permute.xlu0 %691 }
 0x162   : > { %v696_v3 = vpop.permute.xlu1 %695 }
 0x163   : > { %v745_v11 = vsel %vm744_vm4, %v692_v2, %v696_v3  ;;  %vm809_vm4 = vcmask 842752  }
 0x165   : > { %v684_v4 = vpop.permute.xlu0 %683 }
 0x166   : > { %v688_v5 = vpop.permute.xlu1 %687  ;;  %v739_v10 = vsel %vm738_vm3, %v737_v8, %v684_v4 }
 0x167   : > { %v741_v13 = vsel %vm740_vm5, %v739_v10, %v688_v5  ;;  %vm855_vm5 = vcmask 637952  }
 0x168   : > { %v743_v18 = vsel %vm742_vm9, %v741_v13, %v692_v2 }
 0x169   : > { %v700_v7 = vpop.permute.xlu0 %699 }
 0x16a   : > { %v712_v9 = vpop.permute.xlu1 %711  ;;  %v747_v14 = vsel %vm746_vm6, %v745_v11, %v700_v7  ;;  %vm3107_vm6 = vmmov 0  }
 0x16b   : > { %2491 = vmatprep.mubr.msk.f32.mxu0 %vm3107_vm6, %v3093_v61 }
 0x16d   : > { %v708_v12 = vpop.permute.xlu0 %707 }
 0x16e   : > { %v704_v15 = vpop.permute.xlu1 %703 }
 0x16f   : > { %v749_v16 = vsel %vm748_vm7, %v747_v14, %v704_v15  ;;  %vm931_vm7 = vcmask 203776  }
 0x170   : > { %v751_v17 = vsel %vm750_vm8, %v749_v16, %v708_v12  ;;  %vm1528_vm8 = vcmask 293888  }
 0x171   : > { %v753_v19 = vsel %vm752_vm10, %v751_v17, %v712_v9  ;;  %v716_v20 = vpop.permute.xlu0 %715 }
 0x172   : > { %v720_v21 = vpop.permute.xlu1 %719  ;;  %v754_v22 = vsel %vm498_vm0, %v712_v9, %v716_v20  ;;  %v2643_v23 = vpack.i.bf16 %v753_v19, %v743_v18  ;;  %vm820_vm0 = vcmask 834560  }
 0x173   : > { %v756_v24 = vsel %vm755_vm11, %v754_v22, %v720_v21 }
 0x174   : > { %2644 = vrot.lane.b32.xlu1 %v2643_v23, %s3099_s22 }
 0x175   : > { %v724_v25 = vpop.permute.xlu0 %723 }
 0x176   : > { %v728_v26 = vpop.permute.xlu1 %727  ;;  %v758_v27 = vsel %vm757_vm12, %v756_v24, %v724_v25 }
 0x177   : > { %v760_v28 = vsel %vm759_vm13, %v758_v27, %v728_v26 }
 0x178   : > { %2649 = vrot.lane.b32.xlu1 %v2643_v23, %s3100_s23 }
 0x179   : > { %v732_v29 = vpop.permute.xlu0 %731 }
 0x17a   : > { %v762_v30 = vsel %vm761_vm14, %v760_v28, %v732_v29 }
 0x17b   : > { %v2678_v31 = vpack.i.bf16 %v3093_v61, %v762_v30 }
 0x17c   : > { %2654 = vrot.lane.b32.xlu1 %v2643_v23, %s3098_s21 }
 0x17d   : > { %2679 = vrot.lane.b32.xlu0 %v2678_v31, %s3099_s22 }
 0x180   : > { %2659 = vrot.lane.b32.xlu1 %v2643_v23, %s3101_s24 }
 0x181   : > { %2684 = vrot.lane.b32.xlu0 %v2678_v31, %s3100_s23 }
 0x184   : > { %2664 = vrot.lane.b32.xlu1 %v2643_v23, %s3102_s25 }
 0x185   : > { %2689 = vrot.lane.b32.xlu0 %v2678_v31, %s3098_s21 }
 0x188   : > { %2669 = vrot.lane.b32.xlu1 %v2643_v23, %s3097_s20 }
 0x189   : > { %807 = vrot.lane.b32.xlu0 %v762_v30, %s3101_s24 }
 0x18c   : > { %2674 = vrot.lane.b32.xlu1 %v2643_v23, %s3103_s26 }
 0x18d   : > { %2694 = vrot.lane.b32.xlu0 %v2678_v31, %s3102_s25 }
 0x190   : > { %847 = vrot.lane.b32.xlu1 %v743_v18, %s3104_s27 }
 0x191   : > { %2699 = vrot.lane.b32.xlu0 %v2678_v31, %s3097_s20 }
 0x194   : > { %851 = vrot.lane.b32.xlu1 %v762_v30, %s3104_s27 }
 0x195   : > { %2704 = vrot.lane.b32.xlu0 %v2678_v31, %s3103_s26 }
 0x198   : > { %2709 = vrot.lane.b32.xlu1 %v2643_v23, %s3105_s28 }
 0x199   : > { %849 = vrot.lane.b32.xlu0 %v753_v19, %s3104_s27 }
 0x19d   : > { %853 = vrot.lane.b32.xlu0 %v3093_v61, %s3104_s27 }
 0x1e6   : > { %v2645_v32 = vpop.permute.xlu1 %2644 }
 0x1e7   : > { %v2647_v46 = vunpack.i.h.bf16 %v2645_v32  ;;  %v2646_v47 = vunpack.i.l.bf16 %v2645_v32 }
 0x1e9   : > { %v778_v56 = vsel %vm776_vm15, %v2646_v47, %v2647_v46 }
 0x1ea   : > { %v3240_v33 = vpop.permute.xlu1 %2649 }
 0x1eb   : > { %v2651_v14 = vunpack.i.l.bf16 %v3240_v33  ;;  %v2652_v19 = vunpack.i.h.bf16 %v3240_v33 }
 0x1ed   : > { %v790_v29 = vsel %vm788_vm1, %v2651_v14, %v2652_v19 }
 0x1ee   : > { %v2655_v34 = vpop.permute.xlu1 %2654 }
 0x1ef   : > { %v2680_v35 = vpop.permute.xlu0 %2679  ;;  %v2657_v54 = vunpack.i.h.bf16 %v2655_v34  ;;  %v2656_v55 = vunpack.i.l.bf16 %v2655_v34 }
 0x1f0   : > { %v2681_v36 = vunpack.i.l.bf16 %v2680_v35  ;;  %v2682_v57 = vunpack.i.h.bf16 %v2680_v35 }
 0x1f1   : > { %v801_v4 = vsel %vm761_vm14, %v2656_v55, %v2657_v54 }
 0x1f2   : > { %v3242_v37 = vpop.permute.xlu1 %2659  ;;  %v2733_v38 = vpack.i.bf16 %v2681_v36, %v762_v30  ;;  %v779_v53 = vsel %vm776_vm15, %v2647_v46, %v2681_v36  ;;  %v777_v7 = vsel %vm776_vm15, %v2682_v57, %v2646_v47  ;;  %v1139_v57 = vld [vmem:[%s3939_s6] sm:$0xf] }
 0x1f3   : > { %v3244_v39 = vpop.permute.xlu0 %2684  ;;  %v2661_v41 = vunpack.i.l.bf16 %v3242_v37  ;;  %v2743_v59 = vpack.i.bf16 %v779_v53, %v778_v56  ;;  %v2723_v12 = vpack.i.bf16 %v777_v7, %v3093_v61  ;;  %v2662_v28 = vunpack.i.h.bf16 %v3242_v37 }
 0x1f4   : > { %2734 = vrot.lane.b32.xlu0 %v2733_v38, %s3105_s28  ;;  %v2686_v44 = vunpack.i.l.bf16 %v3244_v39  ;;  %v3268_v11 = vunpack.i.h.bf16 %v3244_v39 }
 0x1f6   : > { %v2665_v40 = vpop.permute.xlu1 %2664  ;;  %v789_v21 = vsel %vm788_vm1, %v3268_v11, %v2651_v14  ;;  %v791_v25 = vsel %vm788_vm1, %v2652_v19, %v2686_v44 }
 0x1f7   : > { %v2666_v42 = vunpack.i.l.bf16 %v2665_v40  ;;  %v2690_v43 = vpop.permute.xlu0 %2689  ;;  %v2667_v2 = vunpack.i.h.bf16 %v2665_v40  ;;  %v2748_v32 = vpack.i.bf16 %v791_v25, %v790_v29  ;;  %v810_v40 = vsel %vm809_vm4, %v2661_v41, %v2662_v28 }
 0x1f8   : > { %v2691_v45 = vunpack.i.l.bf16 %v2690_v43  ;;  %v2692_v5 = vunpack.i.h.bf16 %v2690_v43 }
 0x1f9   : > { %v2713_v48 = vpack.i.bf16 %v2666_v42, %v2661_v41  ;;  %v821_v13 = vsel %vm820_vm0, %v2666_v42, %v2667_v2 }
 0x1fa   : > { %v3251_v49 = vpop.permute.xlu1 %2669  ;;  %v2738_v50 = vpack.i.bf16 %v2691_v45, %v2686_v44  ;;  %v802_v0 = vsel %vm761_vm14, %v2657_v54, %v2691_v45  ;;  %v800_v16 = vsel %vm761_vm14, %v2692_v5, %v2656_v55  ;;  %v3321_v54 = vld [vmem:[%s482_s18] sm:$0xff]  ;;  %v3324_v55 = vld [vmem:[%s482_s18 + $0x8] sm:$0xff] }
 0x1fb   : > { %2714 = vrot.lane.b32.xlu1 %v2713_v48, %s3105_s28  ;;  %v808_v52 = vpop.permute.xlu0 %807  ;;  %v2671_v60 = vunpack.i.l.bf16 %v3251_v49  ;;  %v2753_v6 = vpack.i.bf16 %v802_v0, %v801_v4  ;;  %v2728_v23 = vpack.i.bf16 %v800_v16, %v789_v21  ;;  %v2672_v38 = vunpack.i.h.bf16 %v3251_v49 }
 0x1fc   : > { %2739 = vrot.lane.b32.xlu0 %v2738_v50, %s3105_s28  ;;  %v811_v34 = vsel %vm809_vm4, %v2662_v28, %v808_v52  ;;  %v3108_v48 = vmov 0   ;;  %v3328_v56 = vcombine.high %v3321_v54, %v3321_v54 }
 0x1fd   : > { %v2758_v42 = vpack.i.bf16 %v811_v34, %v810_v40  ;;  %v832_v47 = vsel %vm759_vm13, %v2671_v60, %v2672_v38  ;;  %2788 = vset.pattern.permute.xlu1 %v3108_v48  ;;  %2789 = vset.pattern.permute.xlu0 %v3108_v48 }
 0x1fe   : > { %v2675_v58 = vpop.permute.xlu1 %2674 }
 0x1ff   : > { %v2676_v62 = vunpack.i.l.bf16 %v2675_v58  ;;  %v2695_v63 = vpop.permute.xlu0 %2694  ;;  %v2677_v22 = vunpack.i.h.bf16 %v2675_v58  ;;  %v1313_v58 = vcombine.low %v3324_v55, %v3324_v55 }
 0x200   : > { %v2696_v1 = vunpack.i.l.bf16 %v2695_v63  ;;  %2744 = vrot.lane.b32.xlu0 %v2743_v59, %s3105_s28  ;;  %v2697_v8 = vunpack.i.h.bf16 %v2695_v63  ;;  %v1130_v59 = vld [vmem:[%s3938_s5] sm:$0xf]  ;;  %v1312_v63 = vcombine.low %v3321_v54, %v3321_v54 }
 0x201   : > { %v2718_v3 = vpack.i.bf16 %v2676_v62, %v2671_v60  ;;  %v844_v33 = vsel %vm843_vm2, %v2676_v62, %v2677_v22  ;;  %v2800_v60 = vpack.i.bf16 %v3324_v55, %v3328_v56  ;;  %v2790_v62 = vpack.i.bf16 %v1313_v58, %v3321_v54 }
 0x202   : > { %v822_v10 = vsel %vm820_vm0, %v2667_v2, %v2696_v1  ;;  %v823_v18 = vsel %vm820_vm0, %v2696_v1, %v2697_v8  ;;  %v848_v39 = vpop.permute.xlu1 %847  ;;  %v2795_v0 = vpack.i.bf16 %v1312_v63, %v3324_v55  ;;  %v3349_v1 = vcombine.high %v3324_v55, %v3324_v55 }
 0x203   : > { %2719 = vrot.lane.b32.xlu1 %v2718_v3, %s3105_s28  ;;  %v2700_v9 = vpop.permute.xlu0 %2699  ;;  %v2763_v15 = vpack.i.bf16 %v822_v10, %v821_v13  ;;  %v2768_v24 = vpack.i.bf16 %v823_v18, %v808_v52  ;;  %v1305_v3 = vld [vmem:[%s482_s18 + $0x10] sm:$0xf] }
 0x204   : > { %2754 = vrot.lane.b32.xlu0 %v2753_v6, %s3105_s28  ;;  %v3287_v30 = vunpack.i.h.bf16 %v2700_v9  ;;  %v2701_v31 = vunpack.i.l.bf16 %v2700_v9  ;;  %v2805_v2 = vpack.i.bf16 %v3321_v54, %v3349_v1  ;;  %v1372_v4 = vcombine.low %v1305_v3, %v1305_v3 }
 0x205   : > { %v2840_v6 = vpack.i.bf16 %v1305_v3, %v3349_v1 }
 0x206   : > { %v834_v43 = vsel %vm759_vm13, %v2701_v31, %v3287_v30  ;;  %v833_v46 = vsel %vm759_vm13, %v2672_v38, %v2701_v31  ;;  %v852_v41 = vpop.permute.xlu1 %851  ;;  %v2830_v5 = vpack.i.bf16 %v1372_v4, %v3324_v55 }
 0x207   : > { %2724 = vrot.lane.b32.xlu1 %v2723_v12, %s3105_s28  ;;  %v2705_v17 = vpop.permute.xlu0 %2704  ;;  %v2773_v37 = vpack.i.bf16 %v833_v46, %v832_v47 }
 0x208   : > { %v2706_v20 = vunpack.i.l.bf16 %v2705_v17  ;;  %2764 = vrot.lane.b32.xlu0 %v2763_v15, %s3105_s28  ;;  %v2707_v26 = vunpack.i.h.bf16 %v2705_v17 }
 0x20a   : > { %v845_v27 = vsel %vm843_vm2, %v2677_v22, %v2706_v20  ;;  %v846_v36 = vsel %vm843_vm2, %v2706_v20, %v2707_v26  ;;  %v2710_v8 = vpop.permute.xlu1 %2709 }
 0x20b   : > { %2729 = vrot.lane.b32.xlu1 %v2728_v23, %s3105_s28  ;;  %v2778_v35 = vpack.i.bf16 %v845_v27, %v844_v33  ;;  %v850_v44 = vpop.permute.xlu0 %849  ;;  %v2783_v45 = vpack.i.bf16 %v846_v36, %v834_v43  ;;  %v2712_v10 = vunpack.i.h.bf16 %v2710_v8  ;;  %v2711_v12 = vunpack.i.l.bf16 %v2710_v8 }
 0x20c   : > { %2769 = vrot.lane.b32.xlu0 %v2768_v24, %s3105_s28  ;;  %v857_v50 = vsel %vm855_vm5, %v850_v44, %v852_v41  ;;  %v856_v49 = vsel %vm855_vm5, %v848_v39, %v850_v44 }
 0x20d   : > { %v933_v22 = vsel %vm931_vm7, %v2711_v12, %v2712_v10 }
 0x20f   : > { %2749 = vrot.lane.b32.xlu1 %v2748_v32, %s3105_s28  ;;  %v3311_v52 = vpop.permute.xlu0 %853 }
 0x210   : > { %2779 = vrot.lane.b32.xlu0 %v2778_v35, %s3105_s28  ;;  %v858_v53 = vsel %vm855_vm5, %v852_v41, %v3311_v52 }
 0x213   : > { %2759 = vrot.lane.b32.xlu1 %v2758_v42, %s3105_s28 }
 0x214   : > { %2784 = vrot.lane.b32.xlu0 %v2783_v45, %s3105_s28 }
 0x217   : > { %2774 = vrot.lane.b32.xlu1 %v2773_v37, %s3105_s28 }
 0x218   : > { %927 = vrot.lane.b32.xlu0 %v857_v50, %s3105_s28 }
 0x21b   : > { %925 = vrot.lane.b32.xlu1 %v856_v49, %s3105_s28 }
 0x21c   : > { %929 = vrot.lane.b32.xlu0 %v858_v53, %s3105_s28 }
 0x21f   : > { %923 = vrot.lane.b32.xlu1 %v848_v39, %s3105_s28 }
 0x220   : > { %1142 = vperm.xlu0 %2789, %v1139_v57  }
 0x223   : > { %1133 = vperm.xlu1 %2788, %v1130_v59  }
 0x224   : > { %2801 = vrot.lane.b32.xlu0 %v2800_v60, %s3100_s23 }
 0x227   : > { %2791 = vrot.lane.b32.xlu1 %v2790_v62, %s3099_s22 }
 0x228   : > { %2811 = vrot.lane.b32.xlu0 %v2790_v62, %s3098_s21 }
 0x22b   : > { %2796 = vrot.lane.b32.xlu1 %v2795_v0, %s3099_s22 }
 0x22c   : > { %2821 = vrot.lane.b32.xlu0 %v2800_v60, %s3101_s24 }
 0x22f   : > { %2806 = vrot.lane.b32.xlu1 %v2805_v2, %s3100_s23 }
 0x230   : > { %2826 = vrot.lane.b32.xlu0 %v2790_v62, %s3102_s25 }
 0x233   : > { %2816 = vrot.lane.b32.xlu1 %v2795_v0, %s3098_s21 }
 0x234   : > { %2836 = vrot.lane.b32.xlu0 %v2800_v60, %s3097_s20 }
 0x237   : > { %2831 = vrot.lane.b32.xlu1 %v2830_v5, %s3102_s25 }
 0x238   : > { %2846 = vrot.lane.b32.xlu0 %v2790_v62, %s3103_s26 }
 0x23b   : > { %2841 = vrot.lane.b32.xlu1 %v2840_v6, %s3097_s20 }
 0x23c   : > { %1418 = vrot.lane.b32.xlu0 %v3328_v56, %s3104_s27 }
 0x23f   : > { %2851 = vrot.lane.b32.xlu1 %v2830_v5, %s3103_s26 }
 0x240   : > { %1422 = vrot.lane.b32.xlu0 %v3349_v1, %s3104_s27 }
 0x243   : > { %1420 = vrot.lane.b32.xlu1 %v3324_v55, %s3104_s27 }
 0x247   : > { %1424 = vrot.lane.b32.xlu1 %v1305_v3, %s3104_s27 }
 0x266   : > { %v2735_v7 = vpop.permute.xlu0 %2734 }
 0x267   : > { %v2736_v13 = vunpack.i.l.bf16 %v2735_v7  ;;  %v2737_v16 = vunpack.i.h.bf16 %v2735_v7 }
 0x269   : > { %v934_v19 = vsel %vm931_vm7, %v2712_v10, %v2736_v13 }
 0x26d   : > { %v3373_v14 = vpop.permute.xlu1 %2714 }
 0x26e   : > { %v2740_v9 = vpop.permute.xlu0 %2739  ;;  %v2717_v42 = vunpack.i.h.bf16 %v3373_v14  ;;  %v2716_v49 = vunpack.i.l.bf16 %v3373_v14 }
 0x26f   : > { %v2742_v43 = vunpack.i.h.bf16 %v2740_v9  ;;  %v2741_v47 = vunpack.i.l.bf16 %v2740_v9 }
 0x272   : > { %v2745_v15 = vpop.permute.xlu0 %2744 }
 0x273   : > { %v2747_v17 = vunpack.i.h.bf16 %v2745_v15  ;;  %v2746_v18 = vunpack.i.l.bf16 %v2745_v15 }
 0x275   : > { %v937_v20 = vsel %vm931_vm7, %v2747_v17, %v2737_v16  ;;  %v3377_v21 = vpop.permute.xlu1 %2719  ;;  %v936_v23 = vsel %vm931_vm7, %v2746_v18, %v2747_v17 }
 0x276   : > { %v2755_v24 = vpop.permute.xlu0 %2754  ;;  %v2533_v25 = vpack.c.bf16 %v936_v23, %v933_v22  ;;  %v2550_v26 = vpack.c.bf16 %v937_v20, %v934_v19  ;;  %v2722_v19 = vunpack.i.h.bf16 %v3377_v21 }
 0x277   : > { %v2757_v38 = vunpack.i.h.bf16 %v2755_v24  ;;  %v2756_v39 = vunpack.i.l.bf16 %v2755_v24 }
 0x278   : > { %2534 = vmatprep.subr.bf16.mxu1 %v2533_v25  ;;  %2551 = vmatpush3.bf16.msra.mxu0 %v2550_v26  ;;  %v2721_v25 = vunpack.i.l.bf16 %v3377_v21 }
 0x279   : > { %v2725_v27 = vpop.permute.xlu1 %2724  ;;  %2552 = vmatprep.subr.bf16.mxu0 %v3106_v51  ;;  %v943_v53 = vsel %vm931_vm7, %v2757_v38, %v2742_v43  ;;  %v942_v58 = vsel %vm931_vm7, %v2756_v39, %v2757_v38 }
 0x27a   : > { %v2727_v28 = vunpack.i.h.bf16 %v2725_v27  ;;  %v2726_v29 = vunpack.i.l.bf16 %v2725_v27  ;;  %v2765_v31 = vpop.permute.xlu0 %2764 }
 0x27b   : > { %v2767_v44 = vunpack.i.h.bf16 %v2765_v31  ;;  %v2766_v45 = vunpack.i.l.bf16 %v2765_v31 }
 0x27c   : > { %v932_v32 = vsel %vm931_vm7, %v2726_v29, %v2711_v12  ;;  %v935_v33 = vsel %vm931_vm7, %v2727_v28, %v2746_v18 }
 0x27d   : > { %v2730_v34 = vpop.permute.xlu1 %2729  ;;  %v2535_v35 = vpack.c.bf16 %v935_v33, %v932_v32  ;;  %v948_v5 = vsel %vm931_vm7, %v2766_v45, %v2767_v44  ;;  %v947_v10 = vsel %vm931_vm7, %v2717_v42, %v2766_v45  ;;  %v763_v45 = vld [vmem:[%s3937_s4] sm:$0xf] }
 0x27e   : > { %v2770_v36 = vpop.permute.xlu0 %2769  ;;  %v2732_v40 = vunpack.i.h.bf16 %v2730_v34  ;;  %v2731_v37 = vunpack.i.l.bf16 %v2730_v34 }
 0x27f   : > { %2536 = vmatpush1.bf16.msra.mxu1 %v2535_v35  ;;  %v2772_v57 = vunpack.i.h.bf16 %v2770_v36  ;;  %v2771_v6 = vunpack.i.l.bf16 %v2770_v36 }
 0x280   : > { %v941_v63 = vsel %vm931_vm7, %v2732_v40, %v2756_v39 }
 0x281   : > { %v2750_v46 = vpop.permute.xlu1 %2749  ;;  %v949_v12 = vsel %vm931_vm7, %v2767_v44, %v2772_v57 }
 0x282   : > { %v2752_v41 = vunpack.i.h.bf16 %v2750_v46  ;;  %v2751_v48 = vunpack.i.l.bf16 %v2750_v46  ;;  %v2780_v50 = vpop.permute.xlu0 %2779 }
 0x283   : > { %v2782_v13 = vunpack.i.h.bf16 %v2780_v50  ;;  %v2781_v14 = vunpack.i.l.bf16 %v2780_v50 }
 0x284   : > { %v940_v59 = vsel %vm931_vm7, %v2752_v41, %v2741_v47  ;;  %v939_v60 = vsel %vm931_vm7, %v2751_v48, %v2752_v41  ;;  %v938_v62 = vsel %vm931_vm7, %v2731_v37, %v2751_v48 }
 0x285   : > { %v2760_v0 = vpop.permute.xlu1 %2759  ;;  %v2537_v2 = vpack.c.bf16 %v942_v58, %v939_v60  ;;  %v2553_v3 = vpack.c.bf16 %v943_v53, %v940_v59  ;;  %v2539_v4 = vpack.c.bf16 %v941_v63, %v938_v62  ;;  %v954_v32 = vsel %vm931_vm7, %v2781_v14, %v2782_v13 }
 0x286   : > { %v2762_v7 = vunpack.i.h.bf16 %v2760_v0  ;;  %v2761_v8 = vunpack.i.l.bf16 %v2760_v0  ;;  %v2785_v9 = vpop.permute.xlu0 %2784  ;;  %v953_v33 = vsel %vm931_vm7, %v2722_v19, %v2781_v14 }
 0x287   : > { %v2787_v15 = vunpack.i.h.bf16 %v2785_v9  ;;  %2538 = vmatprep.subr.bf16.mxu1 %v2537_v2  ;;  %2554 = vmatpush3.bf16.msra.mxu0 %v2553_v3  ;;  %v2786_v26 = vunpack.i.l.bf16 %v2785_v9 }
 0x288   : > { %v946_v16 = vsel %vm931_vm7, %v2762_v7, %v2771_v6  ;;  %2540 = vmatpush1.bf16.msra.mxu1 %v2539_v4  ;;  %2555 = vmatprep.subr.bf16.mxu0 %v3106_v51  ;;  %v945_v17 = vsel %vm931_vm7, %v2761_v8, %v2762_v7  ;;  %v944_v18 = vsel %vm931_vm7, %v2716_v49, %v2761_v8 }
 0x289   : > { %v2775_v20 = vpop.permute.xlu1 %2774  ;;  %v2541_v22 = vpack.c.bf16 %v948_v5, %v945_v17  ;;  %v2556_v23 = vpack.c.bf16 %v949_v12, %v946_v16  ;;  %v2543_v24 = vpack.c.bf16 %v947_v10, %v944_v18  ;;  %v955_v31 = vsel %vm931_vm7, %v2782_v13, %v2787_v15 }
 0x28a   : > { %v2777_v27 = vunpack.i.h.bf16 %v2775_v20  ;;  %v2776_v28 = vunpack.i.l.bf16 %v2775_v20  ;;  %v928_v29 = vpop.permute.xlu0 %927 }
 0x28b   : > { %2542 = vmatprep.subr.bf16.mxu1 %v2541_v22  ;;  %2557 = vmatpush3.bf16.msra.mxu0 %v2556_v23 }
 0x28c   : > { %v952_v34 = vsel %vm931_vm7, %v2777_v27, %v2786_v26  ;;  %2544 = vmatpush1.bf16.msra.mxu1 %v2543_v24  ;;  %2558 = vmatprep.subr.bf16.mxu0 %v3106_v51  ;;  %v951_v35 = vsel %vm931_vm7, %v2776_v28, %v2777_v27  ;;  %v950_v21 = vsel %vm931_vm7, %v2721_v25, %v2776_v28  ;;  %v1152_v27 = vlaneseq }
 0x28d   : > { %v926_v36 = vpop.permute.xlu1 %925  ;;  %v2545_v38 = vpack.c.bf16 %v954_v32, %v951_v35  ;;  %v2559_v39 = vpack.c.bf16 %v955_v31, %v952_v34  ;;  %v2547_v40 = vpack.c.bf16 %v953_v33, %v950_v21  ;;  %v488_v32 = vld [vmem:[%s3936_s3] sm:$0x7] }
 0x28e   : > { %v930_v42 = vpop.permute.xlu0 %929  ;;  %v957_v43 = vsel %vm931_vm7, %v926_v36, %v928_v29  ;;  %v1153_v28 = vshrl.u32 %v1152_v27, 7 }
 0x28f   : > { %2546 = vmatprep.subr.bf16.mxu1 %v2545_v38  ;;  %2560 = vmatpush3.bf16.msra.mxu0 %v2559_v39  ;;  %v958_v46 = vsel %vm931_vm7, %v928_v29, %v930_v42 }
 0x290   : > { %2548 = vmatpush1.bf16.msra.mxu1 %v2547_v40  ;;  %2489 = vmatprep.subr.mxu0 %v3093_v61  ;;  %v1162_v29 = vsub.s32 2, %v1153_v28  ;;  %v1154_v33 = vsub.s32 0, %v1153_v28 }
 0x291   : > { %v924_v44 = vpop.permute.xlu1 %923  ;;  %1005 = vmatprep.subr.mxu1 %v957_v43 }
 0x292   : > { %v956_v47 = vsel %vm931_vm7, %v924_v44, %v926_v36  ;;  %v1158_v36 = vsub.s32 1, %v1153_v28  ;;  %v3490_v40 = vrot.slane %v488_v32, %v1162_v29  ;;  %v3492_v44 = vrot.slane %v488_v32, %v1154_v33 }
 0x293   : > { %2490 = vmatpush3.msra.mxu0 %v958_v46 }
 0x294   : > { %1006 = vmatpush1.msra.mxu1 %v956_v47  ;;  %2492 = vmatmul.mubr.msk.f32.vlgmr.msra.gmra.mrb[8].mxu0 %vm738_vm3, %v763_v45 }
 0x295   : > { %2402 = vmatmul.mubr.msk.f32.vlgmr.msra.gmra.mrb[0].mxu1 %vm738_vm3, %v763_v45  ;;  %2569 = vmatprep.subr.bf16.mxu0 %v3106_v51  ;;  %vm1285_vm3 = vcmask 1043456  }
 0x296   : > { %2504 = vmatprep.mubr.msk.f32.mxu0 %vm3107_vm6, %v3093_v61  ;;  %1602 = vmatprep.mubr.f32.mxu1 %v3093_v61 }
 0x29f   : > { %v1143_v41 = vpop.permute.xlu0 %1142 }
 0x2a2   : > { %v1134_v37 = vpop.permute.xlu1 %1133 }
 0x2a3   : > { %v3423_v50 = vpop.permute.xlu0 %2801 }
 0x2a6   : > { %v3421_v48 = vpop.permute.xlu1 %2791 }
 0x2a7   : > { %v3427_v53 = vpop.permute.xlu0 %2811 }
 0x2aa   : > { %v3425_v49 = vpop.permute.xlu1 %2796 }
 0x2ab   : > { %v3431_v58 = vpop.permute.xlu0 %2821  ;;  %v2798_v33 = vunpack.i.l.bf16 %v3425_v49 }
 0x2ac   : > { %v2824_v14 = vunpack.i.h.bf16 %v3431_v58  ;;  %v2823_v15 = vunpack.i.l.bf16 %v3431_v58 }
 0x2ae   : > { %v3429_v57 = vpop.permute.xlu1 %2806  ;;  %v1365_v19 = vsel %vm809_vm4, %v2823_v15, %v2824_v14 }
 0x2af   : > { %v2827_v62 = vpop.permute.xlu0 %2826 }
 0x2b0   : > { %v2829_v63 = vunpack.i.h.bf16 %v2827_v62  ;;  %v2828_v16 = vunpack.i.l.bf16 %v2827_v62  ;;  %v3494_v62 = vrot.slane %v488_v32, %v1158_v36  ;;  %v2793_v32 = vunpack.i.l.bf16 %v3421_v48 }
 0x2b1   : > { %v2803_v36 = vunpack.i.l.bf16 %v3423_v50 }
 0x2b2   : > { %v3433_v59 = vpop.permute.xlu1 %2816  ;;  %v1381_v20 = vsel %vm820_vm0, %v2828_v16, %v2829_v63  ;;  %v3470_v22 = vsel %vm1285_vm3, %v2823_v15, %v2828_v16  ;;  %v1174_v15 = vrot.slane %v3093_v61, 4 }
 0x2b3   : > { %v3457_v12 = vpop.permute.xlu0 %2836  ;;  %v3480_v24 = vsel %vm1285_vm3, %v1365_v19, %v1381_v20 }
 0x2b4   : > { %v2838_v17 = vunpack.i.l.bf16 %v3457_v12 }
 0x2b6   : > { %v3435_v60 = vpop.permute.xlu1 %2831 }
 0x2b7   : > { %v2833_v0 = vunpack.i.l.bf16 %v3435_v60  ;;  %v3459_v13 = vpop.permute.xlu0 %2846 }
 0x2b8   : > { %v2848_v18 = vunpack.i.l.bf16 %v3459_v13 }
 0x2b9   : > { %v3441_v2 = vsel %vm820_vm0, %v2829_v63, %v2833_v0 }
 0x2ba   : > { %v3443_v3 = vpop.permute.xlu1 %2841  ;;  %v3477_v23 = vsel %vm1285_vm3, %v2838_v17, %v2848_v18 }
 0x2bb   : > { %v2844_v4 = vunpack.i.h.bf16 %v3443_v3  ;;  %v2843_v5 = vunpack.i.l.bf16 %v3443_v3  ;;  %v2945_v25 = vpack.i.bf16 %v3477_v23, %v3470_v22 }
 0x2bd   : > { %v1398_v6 = vsel %vm759_vm13, %v2843_v5, %v2844_v4 }
 0x2be   : > { %v3450_v7 = vpop.permute.xlu1 %2851 }
 0x2bf   : > { %v2854_v8 = vunpack.i.h.bf16 %v3450_v7  ;;  %v2853_v9 = vunpack.i.l.bf16 %v3450_v7 }
 0x2c1   : > { %v1413_v10 = vsel %vm843_vm2, %v2853_v9, %v2854_v8 }
 0x2c2   : > { %v3485_v26 = vsel %vm1285_vm3, %v1398_v6, %v1413_v10  ;;  %v1421_v3 = vpop.permute.xlu1 %1420 }
 0x367   : > { %v1126_v31 = vpop.f32.mrb[8].mxu0 }
 0x368   : > { %v1138_v34 = vmul.f32 %v1134_v37, %v1126_v31  ;;  %v1055_v35 = vpop.f32.mrb[0].mxu1  ;;  %v2493_v21 = vpop.f32.mrb[9].mxu0  ;;  %v2794_v31 = vunpack.i.h.bf16 %v3421_v48  ;;  %v2809_v48 = vunpack.i.h.bf16 %v3429_v57 }
 0x369   : > { %v1136_v38 = vmul.f32 %v1134_v37, %v1055_v35  ;;  %v1057_v39 = vpop.f32.mrb[1].mxu1  ;;  %v2799_v21 = vunpack.i.h.bf16 %v3425_v49 }
 0x36a   : > { %v1147_v42 = vadd.f32 %v1143_v41, %v1138_v34  ;;  %v1137_v43 = vmul.f32 %v1134_v37, %v1057_v39  ;;  %v2804_v34 = vunpack.i.h.bf16 %v3423_v50  ;;  %v1323_v35 = vsel %vm776_vm15, %v2793_v32, %v2794_v31 }
 0x36b   : > { %v1145_v45 = vadd.f32 %v1143_v41, %v1136_v38  ;;  %v2814_v38 = vunpack.i.h.bf16 %v3427_v53  ;;  %v1324_v39 = vsel %vm776_vm15, %v2794_v31, %v2798_v33  ;;  %v1322_v49 = vsel %vm776_vm15, %v2799_v21, %v2793_v32 }
 0x36c   : > { %v1150_v46 = vmax.f32 %v1147_v42, 0.0  ;;  %v1146_v47 = vadd.f32 %v1143_v41, %v1137_v43  ;;  %v2808_v42 = vunpack.i.l.bf16 %v3429_v57  ;;  %v2813_v43 = vunpack.i.l.bf16 %v3427_v53 }
 0x36d   : > { %v1148_v63 = vmax.f32 %v1145_v45, 0.0  ;;  %v2819_v45 = vunpack.i.h.bf16 %v3433_v59  ;;  %v1338_v50 = vsel %vm788_vm1, %v2803_v36, %v2804_v34  ;;  %v1431_v53 = vsel %vm1285_vm3, %v3324_v55, %v1324_v39 }
 0x36e   : > { %v3497_v4 = vmul.f32 %v3490_v40, %v1150_v46  ;;  %v1149_v6 = vmax.f32 %v1146_v47, 0.0  ;;  %v2818_v46 = vunpack.i.l.bf16 %v3433_v59  ;;  %v1353_v47 = vsel %vm761_vm14, %v2813_v43, %v2814_v38 }
 0x36f   : > { %v3500_v8 = vmul.f32 %v3492_v44, %v1148_v63  ;;  %v1430_v63 = vsel %vm1285_vm3, %v3328_v56, %v1323_v35  ;;  %v1337_v57 = vsel %vm788_vm1, %v2809_v48, %v2803_v36  ;;  %v1339_v59 = vsel %vm788_vm1, %v2804_v34, %v2808_v42 }
 0x370   : > { %v3503_v10 = vmul.f32 %v3494_v62, %v1149_v6  ;;  %1252 = vrot.lane.b32.xlu0 %v3497_v4, %s3097_s20  ;;  %1197 = vrot.lane.b32.xlu1 %v3497_v4, %s3100_s23  ;;  %v1177_v16 = vrot.slane %v3497_v4, 4  ;;  %v1352_v6 = vsel %vm761_vm14, %v2819_v45, %v2813_v43  ;;  %v1434_v56 = vsel %vm1285_vm3, %v1338_v50, %v1353_v47 }
 0x371   : > { %v2855_v37 = vpack.i.bf16 %v3500_v8, %v3349_v1  ;;  %v1175_v27 = vrot.slane %v3500_v8, 4  ;;  %v1429_v55 = vsel %vm1285_vm3, %v3321_v54, %v1322_v49  ;;  %v1436_v31 = vsel %vm1285_vm3, %v2808_v42, %v2818_v46 }
 0x372   : > { %v2865_v41 = vpack.i.bf16 %v3503_v10, %v3500_v8  ;;  %v2875_v19 = vpack.i.bf16 %v3497_v4, %v3503_v10  ;;  %v2860_v20 = vpack.i.bf16 %v1174_v15, %v1177_v16  ;;  %v1176_v28 = vrot.slane %v3503_v10, 4 }
 0x373   : > { %v1433_v16 = vsel %vm1285_vm3, %v1337_v57, %v1352_v6  ;;  %v2834_v21 = vunpack.i.h.bf16 %v3435_v60 }
 0x374   : > { %2866 = vrot.lane.b32.xlu0 %v2865_v41, %s3100_s23  ;;  %2856 = vrot.lane.b32.xlu1 %v2855_v37, %s3101_s24  ;;  %v2890_v29 = vpack.i.bf16 %v1176_v28, %v1175_v27  ;;  %v1354_v37 = vsel %vm761_vm14, %v2814_v38, %v2818_v46  ;;  %v2925_v28 = vpack.i.bf16 %v1433_v16, %v1429_v55 }
 0x375   : > { %v1435_v15 = vsel %vm1285_vm3, %v1339_v59, %v1354_v37  ;;  %v1383_v48 = vsel %vm820_vm0, %v2833_v0, %v2834_v21 }
 0x376   : > { %v2920_v27 = vpack.i.bf16 %v1435_v15, %v1434_v56 }
 0x378   : > { %2876 = vrot.lane.b32.xlu0 %v2875_v19, %s3101_s24  ;;  %2861 = vrot.lane.b32.xlu1 %v2860_v20, %s3099_s22  ;;  %v2839_v19 = vunpack.i.h.bf16 %v3457_v12 }
 0x37a   : > { %v1396_v54 = vsel %vm759_vm13, %v2838_v17, %v2839_v19  ;;  %v1397_v34 = vsel %vm759_vm13, %v2839_v19, %v2843_v5  ;;  %v1419_v5 = vpop.permute.xlu0 %1418 }
 0x37c   : > { %2881 = vrot.lane.b32.xlu0 %v2860_v20, %s3102_s25  ;;  %2871 = vrot.lane.b32.xlu1 %v2860_v20, %s3098_s21 }
 0x37e   : > { %v1423_v7 = vpop.permute.xlu0 %1422 }
 0x380   : > { %2891 = vrot.lane.b32.xlu0 %v2890_v29, %s3099_s22  ;;  %2886 = vrot.lane.b32.xlu1 %v2865_v41, %s3097_s20  ;;  %v2915_v41 = vpack.i.bf16 %v1431_v53, %v1430_v63  ;;  %v1427_v63 = vsel %vm855_vm5, %v1421_v3, %v1423_v7 }
 0x384   : > { %2896 = vrot.lane.b32.xlu0 %v2890_v29, %s3098_s21  ;;  %2906 = vrot.lane.b32.xlu1 %v2890_v29, %s3102_s25 }
 0x388   : > { %2901 = vrot.lane.b32.xlu0 %v2860_v20, %s3103_s26  ;;  %2911 = vrot.lane.b32.xlu1 %v2890_v29, %s3103_s26  ;;  %v2849_v20 = vunpack.i.h.bf16 %v3459_v13  ;;  %v1432_v29 = vsel %vm1285_vm3, %v3349_v1, %v2798_v33 }
 0x389   : > { %v2930_v1 = vpack.i.bf16 %v1436_v31, %v1432_v29 }
 0x38a   : > { %v1411_v32 = vsel %vm843_vm2, %v2848_v18, %v2849_v20  ;;  %v1412_v35 = vsel %vm843_vm2, %v2849_v20, %v2853_v9  ;;  %v1425_v18 = vpop.permute.xlu1 %1424 }
 0x38b   : > { %v1442_v12 = vsel %vm1285_vm3, %v1396_v54, %v1411_v32  ;;  %v1443_v17 = vsel %vm1285_vm3, %v1397_v34, %v1412_v35  ;;  %v1428_v56 = vsel %vm855_vm5, %v1423_v7, %v1425_v18 }
 0x38c   : > { %1278 = vrot.lane.b32.xlu0 %v3503_v10, %s3104_s27  ;;  %1276 = vrot.lane.b32.xlu1 %v3500_v8, %s3104_s27  ;;  %v2940_v13 = vpack.i.bf16 %v1443_v17, %v1442_v12 }
 0x390   : > { %1280 = vrot.lane.b32.xlu1 %v3497_v4, %s3104_s27  ;;  %2916 = vrot.lane.b32.xlu0 %v2915_v41, %s3105_s28 }
 0x394   : > { %2921 = vrot.lane.b32.xlu1 %v2920_v27, %s3105_s28  ;;  %2926 = vrot.lane.b32.xlu0 %v2925_v28, %s3105_s28 }
 0x398   : > { %2931 = vrot.lane.b32.xlu1 %v2930_v1, %s3105_s28 }
 0x39c   : > { %2941 = vrot.lane.b32.xlu1 %v2940_v13, %s3105_s28 }
 0x3e2   : > { %v3591_v33 = vpop.permute.xlu0 %1252  ;;  %v3593_v9 = vpop.permute.xlu1 %1197 }
 0x3e3   : > { %v1256_v22 = vsel %vm759_vm13, %v3591_v33, %v3287_v30 }
 0x3e6   : > { %v3596_v36 = vpop.permute.xlu0 %2866  ;;  %v3598_v38 = vpop.permute.xlu1 %2856 }
 0x3e7   : > { %v2858_v39 = vunpack.i.l.bf16 %v3598_v38  ;;  %v2868_v23 = vunpack.i.l.bf16 %v3596_v36  ;;  %v2869_v55 = vunpack.i.h.bf16 %v3596_v36  ;;  %v2859_v27 = vunpack.i.h.bf16 %v3598_v38 }
 0x3e9   : > { %v1366_v42 = vsel %vm809_vm4, %v2824_v14, %v2858_v39  ;;  %v1440_v46 = vsel %vm1285_vm3, %v2858_v39, %v1383_v48  ;;  %v1199_v17 = vsel %vm788_vm1, %v3268_v11, %v2868_v23 }
 0x3ea   : > { %v3607_v43 = vpop.permute.xlu0 %2876  ;;  %v3609_v45 = vpop.permute.xlu1 %2861  ;;  %v1439_v50 = vsel %vm1285_vm3, %v1366_v42, %v3441_v2  ;;  %v2950_v49 = vpack.i.bf16 %v3485_v26, %v1440_v46 }
 0x3eb   : > { %v2935_v47 = vpack.i.bf16 %v1439_v50, %v3480_v24  ;;  %v2863_v60 = vunpack.i.l.bf16 %v3609_v45  ;;  %v2879_v28 = vunpack.i.h.bf16 %v3607_v43  ;;  %v2864_v13 = vunpack.i.h.bf16 %v3609_v45 }
 0x3ec   : > { %2951 = vrot.lane.b32.xlu1 %v2950_v49, %s3105_s28  ;;  %v1200_v49 = vsel %vm788_vm1, %v2868_v23, %v2869_v55 }
 0x3ed   : > { %2936 = vrot.lane.b32.xlu0 %v2935_v47, %s3105_s28  ;;  %v1289_v2 = vsel %vm1285_vm3, %v3497_v4, %v2863_v60  ;;  %v1426_v4 = vsel %vm855_vm5, %v1419_v5, %v1421_v3 }
 0x3ee   : > { %v3619_v58 = vpop.permute.xlu0 %2881  ;;  %v3621_v0 = vpop.permute.xlu1 %2871 }
 0x3ef   : > { %v2873_v14 = vunpack.i.l.bf16 %v3621_v0  ;;  %v2884_v59 = vunpack.i.h.bf16 %v3619_v58  ;;  %v2883_v6 = vunpack.i.l.bf16 %v3619_v58  ;;  %v2874_v29 = vunpack.i.h.bf16 %v3621_v0 }
 0x3f0   : > { %1497 = vrot.lane.b32.xlu1 %v1427_v63, %s3105_s28 }
 0x3f1   : > { %v1293_v24 = vsel %vm1285_vm3, %v3593_v9, %v2873_v14  ;;  %2946 = vrot.lane.b32.xlu0 %v2945_v25, %s3105_s28  ;;  %v1243_v16 = vsel %vm820_vm0, %v2883_v6, %v2884_v59 }
 0x3f2   : > { %v2955_v26 = vpack.i.bf16 %v1293_v24, %v1289_v2  ;;  %v2892_v53 = vpop.permute.xlu0 %2891  ;;  %v3634_v57 = vpop.permute.xlu1 %2886  ;;  %v1297_v18 = vsel %vm1285_vm3, %v2879_v28, %v1243_v16  ;;  %v2878_v24 = vunpack.i.l.bf16 %v3607_v43 }
 0x3f3   : > { %v2894_v25 = vunpack.i.h.bf16 %v2892_v53  ;;  %v2893_v15 = vunpack.i.l.bf16 %v2892_v53  ;;  %v2888_v31 = vunpack.i.l.bf16 %v3634_v57 }
 0x3f4   : > { %2956 = vrot.lane.b32.xlu1 %v2955_v26, %s3105_s28  ;;  %v1227_v16 = vsel %vm809_vm4, %v2859_v27, %v2878_v24 }
 0x3f5   : > { %1495 = vrot.lane.b32.xlu0 %v1426_v4, %s3105_s28  ;;  %v1187_v3 = vsel %vm776_vm15, %v2893_v15, %v2894_v25  ;;  %v1188_v38 = vsel %vm776_vm15, %v2894_v25, %v2863_v60  ;;  %v1186_v47 = vsel %vm776_vm15, %v2864_v13, %v2893_v15  ;;  %v1201_v60 = vsel %vm788_vm1, %v2869_v55, %v3593_v9 }
 0x3f6   : > { %v2897_v37 = vpop.permute.xlu0 %2896  ;;  %v2907_v41 = vpop.permute.xlu1 %2906  ;;  %v2889_v4 = vunpack.i.h.bf16 %v3634_v57 }
 0x3f7   : > { %v2898_v19 = vunpack.i.l.bf16 %v2897_v37  ;;  %v2908_v20 = vunpack.i.l.bf16 %v2907_v41  ;;  %v2899_v34 = vunpack.i.h.bf16 %v2897_v37  ;;  %v2909_v39 = vunpack.i.h.bf16 %v2907_v41 }
 0x3f8   : > { %v1287_v41 = vsel %vm1285_vm3, %v3500_v8, %v1187_v3  ;;  %v1254_v3 = vsel %vm759_vm13, %v2888_v31, %v2889_v4 }
 0x3f9   : > { %1493 = vrot.lane.b32.xlu0 %v1419_v5, %s3105_s28  ;;  %v1214_v5 = vsel %vm761_vm14, %v2874_v29, %v2898_v19  ;;  %v1294_v7 = vsel %vm1285_vm3, %v2859_v27, %v2908_v20  ;;  %v1215_v63 = vsel %vm761_vm14, %v2898_v19, %v2899_v34  ;;  %v1216_v26 = vsel %vm761_vm14, %v2899_v34, %v2873_v14 }
 0x3fa   : > { %v3655_v54 = vpop.permute.xlu0 %2901  ;;  %v2912_v32 = vpop.permute.xlu1 %2911  ;;  %v1290_v53 = vsel %vm1285_vm3, %v1199_v17, %v1214_v5  ;;  %v1242_v9 = vsel %vm820_vm0, %v2909_v39, %v2883_v6  ;;  %v1241_v43 = vsel %vm820_vm0, %v2908_v20, %v2909_v39  ;;  %v1291_v57 = vsel %vm1285_vm3, %v1200_v49, %v1215_v63 }
 0x3fb   : > { %v2904_v35 = vunpack.i.h.bf16 %v3655_v54  ;;  %v2903_v1 = vunpack.i.l.bf16 %v3655_v54  ;;  %v2913_v12 = vunpack.i.l.bf16 %v2912_v32  ;;  %v2914_v37 = vunpack.i.h.bf16 %v2912_v32 }
 0x3fc   : > { %v1292_v15 = vsel %vm1285_vm3, %v1201_v60, %v1216_v26  ;;  %v1295_v32 = vsel %vm1285_vm3, %v1227_v16, %v1241_v43  ;;  %v1255_v17 = vsel %vm759_vm13, %v2889_v4, %v3591_v33 }
 0x3fd   : > { %v1271_v21 = vsel %vm843_vm2, %v2903_v1, %v2904_v35  ;;  %v1298_v36 = vsel %vm1285_vm3, %v2888_v31, %v2913_v12  ;;  %1499 = vrot.lane.b32.xlu0 %v1428_v56, %s3105_s28  ;;  %v1288_v56 = vsel %vm1285_vm3, %v3503_v10, %v1188_v38  ;;  %v1228_v10 = vsel %vm809_vm4, %v2878_v24, %v2879_v28 }
 0x3fe   : > { %v2960_v48 = vpack.i.bf16 %v1298_v36, %v1294_v7  ;;  %v3674_v42 = vpop.permute.xlu0 %1278  ;;  %v3676_v46 = vpop.permute.xlu1 %1276  ;;  %v1301_v50 = vsel %vm1285_vm3, %v1256_v22, %v1271_v21  ;;  %v1286_v22 = vsel %vm1285_vm3, 0.0, %v1186_v47  ;;  %v2975_v19 = vpack.i.bf16 %v1288_v56, %v1287_v41  ;;  %v1912_v41 = vld [vmem:[%s3942_s9] sm:$0xf] }
 0x3ff   : > { %v2965_v2 = vpack.i.bf16 %v1301_v50, %v1297_v18  ;;  %v2970_v25 = vpack.i.bf16 %v1290_v53, %v1286_v22  ;;  %v1270_v6 = vsel %vm843_vm2, %v2914_v37, %v2903_v1  ;;  %v1269_v20 = vsel %vm843_vm2, %v2913_v12, %v2914_v37 }
 0x400   : > { %v1296_v34 = vsel %vm1285_vm3, %v1228_v10, %v1242_v9  ;;  %v2980_v27 = vpack.i.bf16 %v1292_v15, %v1291_v57  ;;  %v1299_v38 = vsel %vm1285_vm3, %v1254_v3, %v1269_v20  ;;  %v1300_v39 = vsel %vm1285_vm3, %v1255_v17, %v1270_v6 }
 0x401   : > { %2966 = vrot.lane.b32.xlu1 %v2965_v2, %s3105_s28  ;;  %2961 = vrot.lane.b32.xlu0 %v2960_v48, %s3105_s28  ;;  %v2985_v36 = vpack.i.bf16 %v1296_v34, %v1295_v32  ;;  %v2990_v63 = vpack.i.bf16 %v1300_v39, %v1299_v38  ;;  %v1282_v24 = vsel %vm855_vm5, %v3676_v46, %v3674_v42 }
 0x402   : > { %v1281_v14 = vpop.permute.xlu1 %1280  ;;  %v2917_v23 = vpop.permute.xlu0 %2916 }
 0x403   : > { %v2919_v55 = vunpack.i.h.bf16 %v2917_v23  ;;  %v2918_v8 = vunpack.i.l.bf16 %v2917_v23  ;;  %v1283_v37 = vsel %vm855_vm5, %v3674_v42, %v1281_v14  ;;  %v1284_v56 = vsel %vm855_vm5, %v1281_v14, %v3311_v52  ;;  %v1921_v42 = vld [vmem:[%s3943_s10] sm:$0xf] }
 0x405   : > { %2971 = vrot.lane.b32.xlu1 %v2970_v25, %s3105_s28  ;;  %2976 = vrot.lane.b32.xlu0 %v2975_v19, %s3105_s28  ;;  %v1502_v1 = vsel %vm931_vm7, %v2918_v8, %v2919_v55 }
 0x406   : > { %v2922_v28 = vpop.permute.xlu1 %2921  ;;  %v2927_v18 = vpop.permute.xlu0 %2926 }
 0x407   : > { %v2924_v5 = vunpack.i.h.bf16 %v2922_v28  ;;  %v2923_v12 = vunpack.i.l.bf16 %v2922_v28  ;;  %v2929_v7 = vunpack.i.h.bf16 %v2927_v18  ;;  %v2928_v21 = vunpack.i.l.bf16 %v2927_v18 }
 0x409   : > { %2981 = vrot.lane.b32.xlu1 %v2980_v27, %s3105_s28  ;;  %v1501_v33 = vsel %vm931_vm7, %v2928_v21, %v2918_v8  ;;  %v1504_v31 = vsel %vm931_vm7, %v2929_v7, %v2923_v12  ;;  %v1505_v48 = vsel %vm931_vm7, %v2923_v12, %v2924_v5  ;;  %2986 = vrot.lane.b32.xlu0 %v2985_v36, %s3105_s28  ;;  %v1302_v12 = vld [vmem:[%s3941_s8] sm:$0xf] }
 0x40a   : > { %v2563_v50 = vpack.c.bf16 %v1504_v31, %v1501_v33  ;;  %v2932_v49 = vpop.permute.xlu1 %2931  ;;  %v2561_v47 = vpack.c.bf16 %v1505_v48, %v1502_v1 }
 0x40b   : > { %v2934_v2 = vunpack.i.h.bf16 %v2932_v49  ;;  %v2933_v60 = vunpack.i.l.bf16 %v2932_v49 }
 0x40c   : > { %2562 = vmatprep.subr.bf16.mxu1 %v2561_v47 }
 0x40d   : > { %2991 = vrot.lane.b32.xlu1 %v2990_v63, %s3105_s28  ;;  %v1503_v26 = vsel %vm931_vm7, %v2919_v55, %v2933_v60  ;;  %v1506_v53 = vsel %vm931_vm7, %v2924_v5, %v2934_v2  ;;  %2564 = vmatpush1.bf16.msra.mxu1 %v2563_v50 }
 0x40e   : > { %1729 = vrot.lane.b32.xlu0 %v1282_v24, %s3105_s28  ;;  %v2570_v4 = vpack.c.bf16 %v1506_v53, %v1503_v26  ;;  %v2942_v22 = vpop.permute.xlu1 %2941 }
 0x40f   : > { %v2944_v9 = vunpack.i.h.bf16 %v2942_v22  ;;  %v2943_v43 = vunpack.i.l.bf16 %v2942_v22 }
 0x410   : > { %2571 = vmatpush3.bf16.msra.mxu0 %v2570_v4 }
 0x411   : > { %1731 = vrot.lane.b32.xlu1 %v1283_v37, %s3105_s28  ;;  %2572 = vmatprep.subr.bf16.mxu0 %v3106_v51  ;;  %v1511_v10 = vsel %vm931_vm7, %v2943_v43, %v2944_v9 }
 0x412   : > { %1727 = vrot.lane.b32.xlu0 %v3676_v46, %s3105_s28 }
 0x415   : > { %1733 = vrot.lane.b32.xlu1 %v1284_v56, %s3105_s28 }
 0x416   : > { %1915 = vperm.xlu0 %2789, %v1912_v41  }
 0x419   : > { %1924 = vperm.xlu1 %2788, %v1921_v42  }
 0x45e   : > { %v2952_v57 = vpop.permute.xlu1 %2951 }
 0x45f   : > { %v2937_v46 = vpop.permute.xlu0 %2936  ;;  %v2954_v23 = vunpack.i.h.bf16 %v2952_v57  ;;  %v2953_v25 = vunpack.i.l.bf16 %v2952_v57 }
 0x460   : > { %v2939_v15 = vunpack.i.h.bf16 %v2937_v46  ;;  %v2938_v55 = vunpack.i.l.bf16 %v2937_v46 }
 0x461   : > { %v1512_v8 = vsel %vm931_vm7, %v2944_v9, %v2954_v23 }
 0x462   : > { %v1509_v14 = vsel %vm931_vm7, %v2939_v15, %v2953_v25  ;;  %v1508_v16 = vsel %vm931_vm7, %v2938_v55, %v2939_v15  ;;  %v1498_v27 = vpop.permute.xlu1 %1497 }
 0x463   : > { %v2573_v19 = vpack.c.bf16 %v1512_v8, %v1509_v14  ;;  %v2947_v6 = vpop.permute.xlu0 %2946  ;;  %v2565_v20 = vpack.c.bf16 %v1511_v10, %v1508_v16 }
 0x464   : > { %v2949_v32 = vunpack.i.h.bf16 %v2947_v6  ;;  %v2948_v34 = vunpack.i.l.bf16 %v2947_v6 }
 0x465   : > { %2566 = vmatprep.subr.bf16.mxu1 %v2565_v20  ;;  %2574 = vmatpush3.bf16.msra.mxu0 %v2573_v19 }
 0x466   : > { %v1507_v17 = vsel %vm931_vm7, %v2948_v34, %v2938_v55  ;;  %v1510_v3 = vsel %vm931_vm7, %v2949_v32, %v2943_v43  ;;  %2502 = vmatprep.subr.mxu0 %v3093_v61  ;;  %v2957_v21 = vpop.permute.xlu1 %2956 }
 0x467   : > { %v2567_v28 = vpack.c.bf16 %v1510_v3, %v1507_v17  ;;  %v1496_v18 = vpop.permute.xlu0 %1495  ;;  %v2959_v63 = vunpack.i.h.bf16 %v2957_v21  ;;  %v2958_v2 = vunpack.i.l.bf16 %v2957_v21 }
 0x468   : > { %v1514_v1 = vsel %vm931_vm7, %v1496_v18, %v1498_v27 }
 0x469   : > { %2568 = vmatpush1.bf16.msra.mxu1 %v2567_v28 }
 0x46a   : > { %2404 = vmatprep.subr.msk.mxu1 %vm1285_vm3, %v1514_v1 }
 0x46b   : > { %v1494_v5 = vpop.permute.xlu0 %1493 }
 0x46c   : > { %v1513_v7 = vsel %vm931_vm7, %v1494_v5, %v1496_v18 }
 0x46d   : > { %2405 = vmatpush1.msk.msra.mxu1 %vm1285_vm3, %v1513_v7 }
 0x46e   : > { %2406 = vmatmul.mubr.msk.f32.vlgmr.msra.gmra.mrb[2].mxu1 %vm1528_vm8, %v1302_v12 }
 0x46f   : > { %v1500_v36 = vpop.permute.xlu0 %1499  ;;  %1835 = vmatprep.mubr.f32.mxu1 %v3093_v61 }
 0x470   : > { %v1515_v38 = vsel %vm931_vm7, %v1498_v27, %v1500_v36  ;;  %v1170_v36 = vld [vmem:[%s3940_s7] sm:$0xf] }
 0x471   : > { %2503 = vmatpush3.msk.msra.mxu0 %vm1285_vm3, %v1515_v38 }
 0x472   : > { %2583 = vmatprep.subr.bf16.mxu0 %v3106_v51  ;;  %2505 = vmatmul.mubr.msk.f32.vlgmr.msra.gmra.mrb[10].mxu0 %vm1528_vm8, %v1302_v12 }
 0x473   : > { %v2967_v39 = vpop.permute.xlu1 %2966  ;;  %v2962_v33 = vpop.permute.xlu0 %2961  ;;  %2517 = vmatprep.mubr.msk.f32.mxu0 %vm3107_vm6, %v3093_v61 }
 0x474   : > { %v2969_v24 = vunpack.i.h.bf16 %v2967_v39  ;;  %v2968_v41 = vunpack.i.l.bf16 %v2967_v39  ;;  %v2963_v23 = vunpack.i.l.bf16 %v2962_v33  ;;  %v2964_v14 = vunpack.i.h.bf16 %v2962_v33 }
 0x477   : > { %v2972_v31 = vpop.permute.xlu1 %2971  ;;  %v2977_v48 = vpop.permute.xlu0 %2976 }
 0x478   : > { %v2979_v50 = vunpack.i.h.bf16 %v2977_v48  ;;  %v2973_v49 = vunpack.i.l.bf16 %v2972_v31  ;;  %v2978_v47 = vunpack.i.l.bf16 %v2977_v48  ;;  %v2974_v26 = vunpack.i.h.bf16 %v2972_v31 }
 0x47a   : > { %v1737_v56 = vsel %vm931_vm7, %v2979_v50, %v2958_v2  ;;  %v1735_v9 = vsel %vm931_vm7, %v2973_v49, %v2978_v47  ;;  %v1736_v8 = vsel %vm931_vm7, %v2978_v47, %v2979_v50 }
 0x47b   : > { %v2982_v60 = vpop.permute.xlu1 %2981  ;;  %v2987_v37 = vpop.permute.xlu0 %2986 }
 0x47c   : > { %v2984_v53 = vunpack.i.h.bf16 %v2982_v60  ;;  %v2983_v4 = vunpack.i.l.bf16 %v2982_v60  ;;  %v2989_v42 = vunpack.i.h.bf16 %v2987_v37  ;;  %v2988_v22 = vunpack.i.l.bf16 %v2987_v37 }
 0x47e   : > { %v1738_v43 = vsel %vm931_vm7, %v2974_v26, %v2983_v4  ;;  %v1740_v57 = vsel %vm931_vm7, %v2984_v53, %v2959_v63  ;;  %v1739_v46 = vsel %vm931_vm7, %v2983_v4, %v2984_v53  ;;  %v1743_v6 = vsel %vm931_vm7, %v2989_v42, %v2968_v41 }
 0x47f   : > { %v2577_v25 = vpack.c.bf16 %v1738_v43, %v1735_v9  ;;  %v2584_v15 = vpack.c.bf16 %v1740_v57, %v1737_v56  ;;  %v2992_v55 = vpop.permute.xlu1 %2991  ;;  %v2575_v19 = vpack.c.bf16 %v1739_v46, %v1736_v8  ;;  %v1741_v20 = vsel %vm931_vm7, %v2963_v23, %v2988_v22 }
 0x480   : > { %v2994_v16 = vunpack.i.h.bf16 %v2992_v55  ;;  %v2993_v10 = vunpack.i.l.bf16 %v2992_v55  ;;  %v1730_v32 = vpop.permute.xlu0 %1729  ;;  %v1742_v34 = vsel %vm931_vm7, %v2988_v22, %v2989_v42 }
 0x481   : > { %2585 = vmatpush3.bf16.msra.mxu0 %v2584_v15  ;;  %2576 = vmatprep.subr.bf16.mxu1 %v2575_v19 }
 0x482   : > { %v1744_v17 = vsel %vm931_vm7, %v2964_v14, %v2993_v10  ;;  %v1746_v3 = vsel %vm931_vm7, %v2994_v16, %v2969_v24  ;;  %2586 = vmatprep.subr.bf16.mxu0 %v3106_v51  ;;  %v1745_v27 = vsel %vm931_vm7, %v2993_v10, %v2994_v16  ;;  %2578 = vmatpush1.bf16.msra.mxu1 %v2577_v25 }
 0x483   : > { %v2581_v28 = vpack.c.bf16 %v1744_v17, %v1741_v20  ;;  %v2587_v18 = vpack.c.bf16 %v1746_v3, %v1743_v6  ;;  %v1732_v1 = vpop.permute.xlu1 %1731  ;;  %v2579_v5 = vpack.c.bf16 %v1745_v27, %v1742_v34 }
 0x484   : > { %v1748_v12 = vsel %vm931_vm7, %v1730_v32, %v1732_v1  ;;  %v1728_v7 = vpop.permute.xlu0 %1727 }
 0x485   : > { %2580 = vmatprep.subr.bf16.mxu1 %v2579_v5  ;;  %2588 = vmatpush3.bf16.msra.mxu0 %v2587_v18  ;;  %v1747_v39 = vsel %vm931_vm7, %v1728_v7, %v1730_v32 }
 0x486   : > { %2515 = vmatprep.subr.mxu0 %v3093_v61  ;;  %2582 = vmatpush1.bf16.msra.mxu1 %v2581_v28 }
 0x487   : > { %v1734_v21 = vpop.permute.xlu1 %1733  ;;  %2409 = vmatprep.subr.msk.mxu1 %vm1285_vm3, %v1748_v12 }
 0x488   : > { %v1749_v38 = vsel %vm931_vm7, %v1732_v1, %v1734_v21 }
 0x489   : > { %2516 = vmatpush3.msk.msra.mxu0 %vm1285_vm3, %v1749_v38 }
 0x48a   : > { %2518 = vmatmul.mubr.msk.f32.vlgmr.msra.gmra.mrb[10].mxu0 %vm1528_vm8, %v1170_v36  ;;  %2597 = vmatprep.subr.bf16.mxu0 %v3106_v51 }
 0x48b   : > { %2410 = vmatpush1.msk.msra.mxu1 %vm1285_vm3, %v1747_v39  ;;  %2530 = vmatprep.mubr.msk.f32.mxu0 %vm3107_vm6, %v3093_v61 }
 0x48c   : > { %2411 = vmatmul.mubr.msk.f32.vlgmr.msra.gmra.mrb[2].mxu1 %vm1528_vm8, %v1170_v36 }
 0x48d   : > { %2214 = vmatprep.mubr.f32.mxu1 %v3093_v61 }
 0x495   : > { %v1916_v33 = vpop.permute.xlu0 %1915 }
 0x498   : > { %v1925_v49 = vpop.permute.xlu1 %1924 }
 0x55d   : > { %v1908_v31 = vpop.f32.mrb[10].mxu0 }
 0x55e   : > { %v1920_v48 = vmul.f32 %v1916_v33, %v1908_v31  ;;  %v2519_v50 = vpop.f32.mrb[11].mxu0 }
 0x55f   : > { %v1837_v47 = vpop.f32.mrb[2].mxu1 }
 0x560   : > { %v1929_v63 = vadd.f32 %v1925_v49, %v1920_v48  ;;  %v1918_v2 = vmul.f32 %v1916_v33, %v1837_v47  ;;  %v1839_v60 = vpop.f32.mrb[3].mxu1 }
 0x561   : > { %v1919_v24 = vmul.f32 %v1916_v33, %v1839_v60 }
 0x562   : > { %v1932_v26 = vmax.f32 %v1929_v63, 0.0  ;;  %v1927_v53 = vadd.f32 %v1925_v49, %v1918_v2 }
 0x563   : > { %v1928_v4 = vadd.f32 %v1925_v49, %v1919_v24 }
 0x564   : > { %v1935_v37 = vmul.f32 %v1932_v26, %v3490_v40  ;;  %v1930_v41 = vmax.f32 %v1927_v53, 0.0 }
 0x565   : > { %v1931_v56 = vmax.f32 %v1928_v4, 0.0 }
 0x566   : > { %v3795_v42 = vmul.f32 %v1930_v41, %v3492_v44  ;;  %1960 = vrot.lane.b32.xlu1 %v1935_v37, %s3100_s23  ;;  %v1942_v40 = vrot.slane %v1935_v37, 4 }
 0x567   : > { %v3799_v22 = vmul.f32 %v1931_v56, %v3494_v62 }
 0x568   : > { %v1940_v44 = vrot.slane %v3795_v42, 4 }
 0x569   : > { %v2995_v9 = vpack.i.bf16 %v3799_v22, %v3795_v42  ;;  %v1941_v43 = vrot.slane %v3799_v22, 4 }
 0x56a   : > { %1986 = vrot.lane.b32.xlu1 %v1935_v37, %s3101_s24 }
 0x56b   : > { %2996 = vrot.lane.b32.xlu0 %v2995_v9, %s3100_s23  ;;  %v3010_v62 = vpack.i.bf16 %v1941_v43, %v1940_v44 }
 0x56e   : > { %2011 = vrot.lane.b32.xlu1 %v1935_v37, %s3097_s20 }
 0x56f   : > { %3001 = vrot.lane.b32.xlu0 %v2995_v9, %s3101_s24 }
 0x572   : > { %1947 = vrot.lane.b32.xlu1 %v1942_v40, %s3099_s22 }
 0x573   : > { %3006 = vrot.lane.b32.xlu0 %v2995_v9, %s3097_s20 }
 0x576   : > { %1973 = vrot.lane.b32.xlu1 %v1942_v40, %s3098_s21 }
 0x577   : > { %3011 = vrot.lane.b32.xlu0 %v3010_v62, %s3099_s22 }
 0x57a   : > { %1998 = vrot.lane.b32.xlu1 %v1942_v40, %s3102_s25 }
 0x57b   : > { %3016 = vrot.lane.b32.xlu0 %v3010_v62, %s3098_s21 }
 0x57e   : > { %2024 = vrot.lane.b32.xlu1 %v1942_v40, %s3103_s26 }
 0x57f   : > { %3021 = vrot.lane.b32.xlu0 %v3010_v62, %s3102_s25 }
 0x582   : > { %2035 = vrot.lane.b32.xlu1 %v3799_v22, %s3104_s27 }
 0x583   : > { %3026 = vrot.lane.b32.xlu0 %v3010_v62, %s3103_s26  ;;  %s2608_s26 = smul.u32 12, %s3949_s30 }
 0x585   : > { %s487_s16 = scalar_lea.vmem %s3947_s14, %s2608_s26 }
 0x587   : > { %2033 = vrot.lane.b32.xlu0 %v3795_v42, %s3104_s27 }
 0x58b   : > { %2037 = vrot.lane.b32.xlu0 %v1935_v37, %s3104_s27 }
 0x5d8   : > { %v1961_v57 = vpop.permute.xlu1 %1960 }
 0x5dc   : > { %v3823_v46 = vpop.permute.xlu1 %1986 }
 0x5dd   : > { %v2997_v23 = vpop.permute.xlu0 %2996 }
 0x5de   : > { %v2999_v20 = vunpack.i.h.bf16 %v2997_v23  ;;  %v2998_v32 = vunpack.i.l.bf16 %v2997_v23 }
 0x5e0   : > { %v2012_v25 = vpop.permute.xlu1 %2011  ;;  %v1963_v28 = vsel %vm788_vm1, %v2998_v32, %v2999_v20  ;;  %v1964_v18 = vsel %vm788_vm1, %v2999_v20, %v1961_v57  ;;  %v1962_v48 = vsel %vm788_vm1, %v3268_v11, %v2998_v32 }
 0x5e1   : > { %v3825_v15 = vpop.permute.xlu0 %3001  ;;  %v2015_v54 = vsel %vm759_vm13, %v2012_v25, %v3287_v30 }
 0x5e2   : > { %v3003_v47 = vunpack.i.l.bf16 %v3825_v15  ;;  %v3004_v30 = vunpack.i.h.bf16 %v3825_v15 }
 0x5e4   : > { %v1948_v55 = vpop.permute.xlu1 %1947  ;;  %v1988_v15 = vsel %vm809_vm4, %v3003_v47, %v3004_v30 }
 0x5e5   : > { %v3007_v8 = vpop.permute.xlu0 %3006  ;;  %v2045_v16 = vsel %vm1285_vm3, %v1935_v37, %v1948_v55 }
 0x5e6   : > { %v3009_v36 = vunpack.i.h.bf16 %v3007_v8  ;;  %v3008_v38 = vunpack.i.l.bf16 %v3007_v8 }
 0x5e8   : > { %v1974_v14 = vpop.permute.xlu1 %1973  ;;  %v2013_v63 = vsel %vm759_vm13, %v3008_v38, %v3009_v36  ;;  %v2014_v24 = vsel %vm759_vm13, %v3009_v36, %v2012_v25 }
 0x5e9   : > { %v3012_v10 = vpop.permute.xlu0 %3011  ;;  %v2049_v19 = vsel %vm1285_vm3, %v1961_v57, %v1974_v14 }
 0x5ea   : > { %v3030_v6 = vpack.i.bf16 %v2049_v19, %v2045_v16  ;;  %v3013_v50 = vunpack.i.l.bf16 %v3012_v10  ;;  %v3014_v26 = vunpack.i.h.bf16 %v3012_v10 }
 0x5ec   : > { %3031 = vrot.lane.b32.xlu0 %v3030_v6, %s3105_s28  ;;  %v1999_v27 = vpop.permute.xlu1 %1998  ;;  %v1949_v9 = vsel %vm776_vm15, %v2864_v13, %v3013_v50  ;;  %v1950_v45 = vsel %vm776_vm15, %v3013_v50, %v3014_v26  ;;  %v1951_v13 = vsel %vm776_vm15, %v3014_v26, %v1948_v55  ;;  %v1989_v6 = vsel %vm809_vm4, %v3004_v30, %v3823_v46 }
 0x5ed   : > { %v3017_v34 = vpop.permute.xlu0 %3016  ;;  %v2042_v8 = vsel %vm1285_vm3, 0.0, %v1949_v9  ;;  %v2044_v55 = vsel %vm1285_vm3, %v3799_v22, %v1951_v13 }
 0x5ee   : > { %v3019_v17 = vunpack.i.h.bf16 %v3017_v34  ;;  %v3018_v3 = vunpack.i.l.bf16 %v3017_v34 }
 0x5f0   : > { %v1976_v1 = vsel %vm761_vm14, %v3018_v3, %v3019_v17  ;;  %v1977_v5 = vsel %vm761_vm14, %v3019_v17, %v1974_v14  ;;  %v2025_v31 = vpop.permute.xlu1 %2024  ;;  %v1975_v53 = vsel %vm761_vm14, %v2874_v29, %v3018_v3  ;;  %v2043_v14 = vsel %vm1285_vm3, %v3795_v42, %v1950_v45 }
 0x5f1   : > { %v3022_v12 = vpop.permute.xlu0 %3021  ;;  %v2047_v7 = vsel %vm1285_vm3, %v1963_v28, %v1976_v1  ;;  %v2048_v21 = vsel %vm1285_vm3, %v1964_v18, %v1977_v5  ;;  %v2028_v4 = vsel %vm843_vm2, %v2025_v31, %v2904_v35  ;;  %v2002_v35 = vsel %vm820_vm0, %v1999_v27, %v2884_v59  ;;  %v2291_v28 = vld [vmem:[%s3945_s12] sm:$0xf] }
 0x5f2   : > { %v3050_v39 = vpack.i.bf16 %v2048_v21, %v2047_v7  ;;  %v3023_v33 = vunpack.i.l.bf16 %v3022_v12  ;;  %v2046_v62 = vsel %vm1285_vm3, %v1962_v48, %v1975_v53  ;;  %v3024_v57 = vunpack.i.h.bf16 %v3022_v12 }
 0x5f3   : > { %v2057_v23 = vsel %vm1285_vm3, %v2015_v54, %v2028_v4  ;;  %v2053_v58 = vsel %vm1285_vm3, %v3823_v46, %v2002_v35  ;;  %v3040_v59 = vpack.i.bf16 %v2046_v62, %v2042_v8  ;;  %v3045_v20 = vpack.i.bf16 %v2044_v55, %v2043_v14  ;;  %v2300_v46 = vld [vmem:[%s3946_s13] sm:$0xf] }
 0x5f4   : > { %3051 = vrot.lane.b32.xlu0 %v3050_v39, %s3105_s28  ;;  %v2050_v11 = vsel %vm1285_vm3, %v3003_v47, %v3023_v33  ;;  %v3065_v25 = vpack.i.bf16 %v2057_v23, %v2053_v58  ;;  %v2000_v16 = vsel %vm820_vm0, %v3023_v33, %v3024_v57  ;;  %v2001_v10 = vsel %vm820_vm0, %v3024_v57, %v1999_v27  ;;  %v2036_v32 = vpop.permute.xlu1 %2035 }
 0x5f5   : > { %v3027_v49 = vpop.permute.xlu0 %3026  ;;  %v2051_v42 = vsel %vm1285_vm3, %v1988_v15, %v2000_v16  ;;  %v2052_v22 = vsel %vm1285_vm3, %v1989_v6, %v2001_v10 }
 0x5f6   : > { %v3029_v2 = vunpack.i.h.bf16 %v3027_v49  ;;  %v3028_v60 = vunpack.i.l.bf16 %v3027_v49  ;;  %v3055_v17 = vpack.i.bf16 %v2052_v22, %v2051_v42 }
 0x5f8   : > { %v2026_v37 = vsel %vm843_vm2, %v3028_v60, %v3029_v2  ;;  %v2054_v41 = vsel %vm1285_vm3, %v3008_v38, %v3028_v60  ;;  %v2027_v56 = vsel %vm843_vm2, %v3029_v2, %v2025_v31 }
 0x5f9   : > { %v3035_v40 = vpack.i.bf16 %v2054_v41, %v2050_v11  ;;  %v2055_v0 = vsel %vm1285_vm3, %v2013_v63, %v2026_v37  ;;  %v2056_v29 = vsel %vm1285_vm3, %v2014_v24, %v2027_v56  ;;  %v2034_v44 = vpop.permute.xlu0 %2033 }
 0x5fa   : > { %v3060_v43 = vpack.i.bf16 %v2056_v29, %v2055_v0  ;;  %v2039_v27 = vsel %vm855_vm5, %v2034_v44, %v2036_v32 }
 0x5fb   : > { %3036 = vrot.lane.b32.xlu1 %v3035_v40, %s3105_s28 }
 0x5fc   : > { %3061 = vrot.lane.b32.xlu0 %v3060_v43, %s3105_s28 }
 0x5fd   : > { %v2038_v19 = vpop.permute.xlu0 %2037 }
 0x5fe   : > { %v2040_v34 = vsel %vm855_vm5, %v2036_v32, %v2038_v19  ;;  %v2041_v3 = vsel %vm855_vm5, %v2038_v19, %v3311_v52 }
 0x5ff   : > { %3041 = vrot.lane.b32.xlu1 %v3040_v59, %s3105_s28 }
 0x600   : > { %3066 = vrot.lane.b32.xlu0 %v3065_v25, %s3105_s28 }
 0x603   : > { %3046 = vrot.lane.b32.xlu1 %v3045_v20, %s3105_s28 }
 0x604   : > { %2110 = vrot.lane.b32.xlu0 %v2040_v34, %s3105_s28 }
 0x607   : > { %3056 = vrot.lane.b32.xlu1 %v3055_v17, %s3105_s28 }
 0x608   : > { %2112 = vrot.lane.b32.xlu0 %v2041_v3, %s3105_s28 }
 0x60b   : > { %2108 = vrot.lane.b32.xlu1 %v2039_v27, %s3105_s28 }
 0x60c   : > { %2303 = vperm.xlu0 %2789, %v2300_v46  }
 0x60f   : > { %2106 = vrot.lane.b32.xlu1 %v2034_v44, %s3105_s28 }
 0x613   : > { %2294 = vperm.xlu1 %2788, %v2291_v28  }
 0x65e   : > { %v3032_v52 = vpop.permute.xlu0 %3031 }
 0x65f   : > { %v3034_v36 = vunpack.i.h.bf16 %v3032_v52  ;;  %v3033_v33 = vunpack.i.l.bf16 %v3032_v52 }
 0x666   : > { %v3052_v18 = vpop.permute.xlu0 %3051 }
 0x667   : > { %v3054_v12 = vunpack.i.h.bf16 %v3052_v18  ;;  %v3053_v21 = vunpack.i.l.bf16 %v3052_v18 }
 0x669   : > { %v2119_v31 = vsel %vm931_vm7, %v3054_v12, %v3034_v36  ;;  %v2118_v63 = vsel %vm931_vm7, %v3053_v21, %v3054_v12 }
 0x66d   : > { %v3037_v1 = vpop.permute.xlu1 %3036 }
 0x66e   : > { %v3062_v5 = vpop.permute.xlu0 %3061  ;;  %v3039_v2 = vunpack.i.h.bf16 %v3037_v1  ;;  %v3038_v29 = vunpack.i.l.bf16 %v3037_v1 }
 0x66f   : > { %v3064_v60 = vunpack.i.h.bf16 %v3062_v5  ;;  %v3063_v24 = vunpack.i.l.bf16 %v3062_v5 }
 0x671   : > { %v3042_v7 = vpop.permute.xlu1 %3041  ;;  %v2123_v43 = vsel %vm931_vm7, %v3039_v2, %v3063_v24  ;;  %v2124_v45 = vsel %vm931_vm7, %v3063_v24, %v3064_v60 }
 0x672   : > { %v3067_v38 = vpop.permute.xlu0 %3066  ;;  %v3044_v39 = vunpack.i.h.bf16 %v3042_v7  ;;  %v3043_v50 = vunpack.i.l.bf16 %v3042_v7 }
 0x673   : > { %v3069_v26 = vunpack.i.h.bf16 %v3067_v38  ;;  %v3068_v54 = vunpack.i.l.bf16 %v3067_v38 }
 0x674   : > { %v2117_v53 = vsel %vm931_vm7, %v3044_v39, %v3053_v21 }
 0x675   : > { %v3047_v48 = vpop.permute.xlu1 %3046  ;;  %v2125_v62 = vsel %vm931_vm7, %v3064_v60, %v3069_v26 }
 0x676   : > { %v3049_v49 = vunpack.i.h.bf16 %v3047_v48  ;;  %v3048_v47 = vunpack.i.l.bf16 %v3047_v48  ;;  %v2111_v9 = vpop.permute.xlu0 %2110 }
 0x678   : > { %v2116_v4 = vsel %vm931_vm7, %v3049_v49, %v3033_v33  ;;  %v2114_v11 = vsel %vm931_vm7, %v3043_v50, %v3048_v47  ;;  %v2115_v37 = vsel %vm931_vm7, %v3048_v47, %v3049_v49 }
 0x679   : > { %v2598_v41 = vpack.c.bf16 %v2119_v31, %v2116_v4  ;;  %v2591_v56 = vpack.c.bf16 %v2117_v53, %v2114_v11  ;;  %v3057_v40 = vpop.permute.xlu1 %3056  ;;  %v2589_v0 = vpack.c.bf16 %v2118_v63, %v2115_v37 }
 0x67a   : > { %v3059_v35 = vunpack.i.h.bf16 %v3057_v40  ;;  %v3058_v44 = vunpack.i.l.bf16 %v3057_v40  ;;  %v2113_v25 = vpop.permute.xlu0 %2112 }
 0x67b   : > { %2590 = vmatprep.subr.bf16.mxu1 %v2589_v0  ;;  %2599 = vmatpush3.bf16.msra.mxu0 %v2598_v41  ;;  %v2128_v16 = vsel %vm931_vm7, %v2111_v9, %v2113_v25 }
 0x67c   : > { %v2122_v13 = vsel %vm931_vm7, %v3059_v35, %v3068_v54  ;;  %v2120_v57 = vsel %vm931_vm7, %v3038_v29, %v3058_v44  ;;  %2592 = vmatpush1.bf16.msra.mxu1 %v2591_v56  ;;  %2600 = vmatprep.subr.bf16.mxu0 %v3106_v51  ;;  %v2121_v23 = vsel %vm931_vm7, %v3058_v44, %v3059_v35  ;;  %v1936_v51 = vld [vmem:[%s3944_s11] sm:$0xf] }
 0x67d   : > { %v2601_v8 = vpack.c.bf16 %v2125_v62, %v2122_v13  ;;  %v2595_v30 = vpack.c.bf16 %v2123_v43, %v2120_v57  ;;  %v2109_v58 = vpop.permute.xlu1 %2108  ;;  %v2593_v59 = vpack.c.bf16 %v2124_v45, %v2121_v23 }
 0x67e   : > { %v2127_v14 = vsel %vm931_vm7, %v2109_v58, %v2111_v9 }
 0x67f   : > { %2594 = vmatprep.subr.bf16.mxu1 %v2593_v59  ;;  %2602 = vmatpush3.bf16.msra.mxu0 %v2601_v8 }
 0x680   : > { %2596 = vmatpush1.bf16.msra.mxu1 %v2595_v30  ;;  %2528 = vmatprep.subr.mxu0 %v3093_v61 }
 0x681   : > { %v2107_v55 = vpop.permute.xlu1 %2106  ;;  %2414 = vmatprep.subr.msk.mxu1 %vm1285_vm3, %v2127_v14 }
 0x682   : > { %v2126_v10 = vsel %vm931_vm7, %v2107_v55, %v2109_v58 }
 0x683   : > { %2529 = vmatpush3.msk.msra.mxu0 %vm1285_vm3, %v2128_v16 }
 0x684   : > { %2415 = vmatpush1.msk.msra.mxu1 %vm1285_vm3, %v2126_v10  ;;  %2531 = vmatmul.mubr.msk.f32.vlgmr.msra.gmra.mrb[12].mxu0 %vm1528_vm8, %v1936_v51 }
 0x685   : > { %2416 = vmatmul.mubr.msk.f32.vlgmr.msra.gmra.mrb[4].mxu1 %vm1528_vm8, %v1936_v51 }
 0x68b   : > { %v2304_v32 = vpop.permute.xlu0 %2303 }
 0x692   : > { %v2295_v61 = vpop.permute.xlu1 %2294 }
 0x757   : > { %v2287_v19 = vpop.f32.mrb[12].mxu0 }
 0x758   : > { %v2299_v15 = vmul.f32 %v2295_v61, %v2287_v19  ;;  %v2216_v6 = vpop.f32.mrb[4].mxu1  ;;  %v2532_v20 = vpop.f32.mrb[13].mxu0 }
 0x759   : > { %v2297_v42 = vmul.f32 %v2295_v61, %v2216_v6  ;;  %v2218_v22 = vpop.f32.mrb[5].mxu1 }
 0x75a   : > { %v2308_v34 = vadd.f32 %v2304_v32, %v2299_v15  ;;  %v2298_v17 = vmul.f32 %v2295_v61, %v2218_v22 }
 0x75b   : > { %v2306_v3 = vadd.f32 %v2304_v32, %v2297_v42 }
 0x75c   : > { %v2311_v46 = vmax.f32 %v2308_v34, 0.0  ;;  %v2307_v27 = vadd.f32 %v2304_v32, %v2298_v17 }
 0x75d   : > { %v2309_v28 = vmax.f32 %v2306_v3, 0.0 }
 0x75e   : > { %2317 = vst [vmem:[%s487_s16 + $0x8] sm:$0xf] %v2311_v46  ;;  %v2310_v52 = vmax.f32 %v2307_v27, 0.0 }
 0x760   : > { %v2314_v18 = vcombine.low %v2309_v28, %v2310_v52 }
 0x762   : > { %2316 = vst [vmem:[%s487_s16] sm:$0xff] %v2314_v18 }
 0x763 PF: > { %s24_s29 = sadd.s32 1, %s3081_s29  }
 0x764   : > { %p21_p4 = scmp.ge.s32.totalorder %s24_s29, 4  }
 0x766   :  { %23 = sbr.rel (!%p21_p4) target bundleno = 1 (0x1), region = 109 }

</bundles_post_ra>
